<compile_context>
chip_gen: v7x
topology: tpu7x:2x2x1
jax: 0.10.0
libtpu: 0.0.40
codegen_flags: <defaults>
</compile_context>

<pallas_src>
import math

import jax
import jax.numpy as jnp
from jax.experimental import pallas as pl
from jax.experimental.pallas import tpu as pltpu

# ---- model hyper-parameters (small, consistent with the module) ----
BATCH = 2
SEQ = 8
D_MODEL = 32
N_HEADS = 4
HEAD_DIM = D_MODEL // N_HEADS
DIM_FF = 64
NUM_LAYERS = 2
LN_EPS = 1e-6
# NOTE: the reference module scales by sqrt(d_model), NOT sqrt(head_dim).
SCALE = 1.0 / math.sqrt(D_MODEL)


def _layernorm(x, gamma, beta, eps):
    mu = jnp.mean(x, axis=-1, keepdims=True)
    var = jnp.mean((x - mu) ** 2, axis=-1, keepdims=True)
    return (x - mu) * jax.lax.rsqrt(var + eps) * gamma + beta


def encoder_stack_kernel(x_ref, wattn_ref, wff1_ref, wff2_ref, vec_ref, out_ref):
    x = x_ref[0]  # (SEQ, D_MODEL)

    for l in range(NUM_LAYERS):  # static unroll over the layer stack
        # ---- unpack this layer's packed parameter slabs (static slices) ----
        vecs = vec_ref[l]                       # (10, DIM_FF)
        ln1_g = vecs[0:1, :D_MODEL]
        ln1_b = vecs[1:2, :D_MODEL]
        bq    = vecs[2:3, :D_MODEL]
        bk    = vecs[3:4, :D_MODEL]
        bv    = vecs[4:5, :D_MODEL]
        bo    = vecs[5:6, :D_MODEL]
        ln2_g = vecs[6:7, :D_MODEL]
        ln2_b = vecs[7:8, :D_MODEL]
        b2    = vecs[8:9, :D_MODEL]
        b1    = vecs[9:10, :]                   # (1, DIM_FF)

        w_all = wattn_ref[l]                    # (4, D_MODEL, D_MODEL)
        wq, wk, wv, wo = w_all[0], w_all[1], w_all[2], w_all[3]

        # ---- pre-norm multi-head attention ----
        h = _layernorm(x, ln1_g, ln1_b, LN_EPS)
        q = (jnp.dot(h, wq, preferred_element_type=jnp.float32) + bq) * SCALE
        k = jnp.dot(h, wk, preferred_element_type=jnp.float32) + bk
        v = jnp.dot(h, wv, preferred_element_type=jnp.float32) + bv

        # per-head views: (N_HEADS, HEAD_DIM, SEQ) via 2-D transpose + leading split
        qh = q.T.reshape(N_HEADS, HEAD_DIM, SEQ)
        kh = k.T.reshape(N_HEADS, HEAD_DIM, SEQ)
        vh = v.T.reshape(N_HEADS, HEAD_DIM, SEQ)

        # one batched contraction for all heads, one batched softmax
        s = jnp.einsum("heq,hek->hqk", qh, kh, preferred_element_type=jnp.float32)
        s = s - jnp.max(s, axis=-1, keepdims=True)
        p = jnp.exp(s)
        p = p / jnp.sum(p, axis=-1, keepdims=True)
        o = jnp.einsum("hqk,hek->hqe", p, vh, preferred_element_type=jnp.float32)

        # output projection without any lane-axis concatenate:
        # concat @ wo == sum_h o[h] @ wo[h*HEAD_DIM:(h+1)*HEAD_DIM, :]
        wo_h = wo.reshape(N_HEADS, HEAD_DIM, D_MODEL)
        ctx = jnp.einsum("hqe,hed->hqd", o, wo_h, preferred_element_type=jnp.float32)
        x = x + jnp.sum(ctx, axis=0) + bo       # residual (mha_dropout is identity)

        # ---- pre-norm feed-forward ----
        h2 = _layernorm(x, ln2_g, ln2_b, LN_EPS)
        f = jnp.dot(h2, wff1_ref[l], preferred_element_type=jnp.float32) + b1
        f = jnp.maximum(f, 0.0)                 # relu activation
        f = jnp.dot(f, wff2_ref[l], preferred_element_type=jnp.float32) + b2
        x = x + f                               # residual (ff_dropout is identity)

    out_ref[0] = x


# ---------------- parameter packing (trace-time, outside the kernel) ----------------
def _pad_cols(v, width):
    return jnp.pad(v, ((0, 0), (0, width - v.shape[1])))


def pack_params(all_layer_params):
    w_attn, w_ff1, w_ff2, vec_rows = [], [], [], []
    for p in all_layer_params:
        (ln1_g, ln1_b, wq, bq, wk, bk, wv, bv, wo, bo,
         ln2_g, ln2_b, w1, b1, w2, b2) = p
        w_attn.append(jnp.stack([wq, wk, wv, wo]))          # (4, D, D)
        w_ff1.append(w1)                                    # (D, DIM_FF)
        w_ff2.append(w2)                                    # (DIM_FF, D)
        rows = [ln1_g, ln1_b, bq, bk, bv, bo, ln2_g, ln2_b, b2, b1]
        vec_rows.append(jnp.concatenate([_pad_cols(r, DIM_FF) for r in rows], axis=0))
    return (jnp.stack(w_attn), jnp.stack(w_ff1),
            jnp.stack(w_ff2), jnp.stack(vec_rows))


@jax.jit
def transformer_encoder(x, all_layer_params):
    w_attn, w_ff1, w_ff2, vecs = pack_params(all_layer_params)
    B, S, D = x.shape
    return pl.pallas_call(
        encoder_stack_kernel,
        out_shape=jax.ShapeDtypeStruct((B, S, D), x.dtype),
        grid=(B,),
        in_specs=[
            pl.BlockSpec((1, S, D), lambda b: (b, 0, 0)),
            pl.BlockSpec(w_attn.shape, lambda b: (0, 0, 0, 0)),
            pl.BlockSpec(w_ff1.shape, lambda b: (0, 0, 0)),
            pl.BlockSpec(w_ff2.shape, lambda b: (0, 0, 0)),
            pl.BlockSpec(vecs.shape, lambda b: (0, 0, 0)),
        ],
        out_specs=pl.BlockSpec((1, S, D), lambda b: (b, 0, 0)),
        compiler_params=pltpu.CompilerParams(dimension_semantics=("parallel",)),
    )(x, w_attn, w_ff1, w_ff2, vecs)


# ---------------- deterministic parameter init ----------------
def _linear_init(key, fan_in, fan_out):
    # mimics nn.Linear default: U(-1/sqrt(fan_in), 1/sqrt(fan_in))
    kw, kb = jax.random.split(key)
    bound = 1.0 / math.sqrt(fan_in)
    w = jax.random.uniform(kw, (fan_in, fan_out), jnp.float32, -bound, bound)
    b = jax.random.uniform(kb, (1, fan_out), jnp.float32, -bound, bound)
    return w, b


def make_layer_params(key):
    keys = jax.random.split(key, 6)
    ln1_g = jnp.ones((1, D_MODEL), jnp.float32)
    ln1_b = jnp.zeros((1, D_MODEL), jnp.float32)
    wq, bq = _linear_init(keys[0], D_MODEL, D_MODEL)
    wk, bk = _linear_init(keys[1], D_MODEL, D_MODEL)
    wv, bv = _linear_init(keys[2], D_MODEL, D_MODEL)
    wo, bo = _linear_init(keys[3], D_MODEL, D_MODEL)
    ln2_g = jnp.ones((1, D_MODEL), jnp.float32)
    ln2_b = jnp.zeros((1, D_MODEL), jnp.float32)
    w1, b1 = _linear_init(keys[4], D_MODEL, DIM_FF)
    w2, b2 = _linear_init(keys[5], DIM_FF, D_MODEL)
    return (ln1_g, ln1_b, wq, bq, wk, bk, wv, bv, wo, bo,
            ln2_g, ln2_b, w1, b1, w2, b2)


# ---------------- pure-JAX reference (for correctness check) ----------------
def ref_layer(x, p):
    (ln1_g, ln1_b, wq, bq, wk, bk, wv, bv, wo, bo,
     ln2_g, ln2_b, w1, b1, w2, b2) = p
    h = _layernorm(x, ln1_g, ln1_b, LN_EPS)
    q = (h @ wq + bq).reshape(x.shape[0], SEQ, N_HEADS, HEAD_DIM).transpose(0, 2, 1, 3)
    k = (h @ wk + bk).reshape(x.shape[0], SEQ, N_HEADS, HEAD_DIM).transpose(0, 2, 1, 3)
    v = (h @ wv + bv).reshape(x.shape[0], SEQ, N_HEADS, HEAD_DIM).transpose(0, 2, 1, 3)
    s = jnp.einsum("bhqd,bhkd->bhqk", q, k) / math.sqrt(D_MODEL)
    pattn = jax.nn.softmax(s, axis=-1)
    o = jnp.einsum("bhqk,bhkd->bhqd", pattn, v).transpose(0, 2, 1, 3).reshape(
        x.shape[0], SEQ, D_MODEL)
    x2 = x + (o @ wo + bo)
    h2 = _layernorm(x2, ln2_g, ln2_b, LN_EPS)
    ff = jnp.maximum(h2 @ w1 + b1, 0.0) @ w2 + b2
    return x2 + ff


def ref_encoder(x, all_params):
    e = x
    for p in all_params:
        e = ref_layer(e, p)
    return e


if __name__ == "__main__":
    root = jax.random.PRNGKey(0)
    kx, kp = jax.random.split(root)
    x = jax.random.normal(kx, (BATCH, SEQ, D_MODEL), jnp.float32)

    layer_keys = jax.random.split(kp, NUM_LAYERS)
    all_params = [make_layer_params(k) for k in layer_keys]

    out = transformer_encoder(x, all_params)
    out = jax.block_until_ready(out)

    ref = jax.block_until_ready(ref_encoder(x, all_params))
    assert out.shape == (BATCH, SEQ, D_MODEL)
    assert jnp.allclose(out, ref, atol=1e-4, rtol=1e-4), "mismatch vs reference"

    print("KERNEL_OK")
</pallas_src>

<mosaic_0001>
module attributes {stable_mosaic.version = 11 : i64} {
  func.func @encoder_stack_kernel(%arg0: i32, %arg1: memref<1x8x32xf32, #tpu.memory_space<vmem>>, %arg2: memref<2x4x32x32xf32, #tpu.memory_space<vmem>>, %arg3: memref<2x32x64xf32, #tpu.memory_space<vmem>>, %arg4: memref<2x64x32xf32, #tpu.memory_space<vmem>>, %arg5: memref<2x10x64xf32, #tpu.memory_space<vmem>>, %arg6: memref<1x8x32xf32, #tpu.memory_space<vmem>>) attributes {dimension_semantics = [#tpu.dimension_semantics<parallel>], iteration_bounds = array<i64: 2>, scalar_prefetch = 0 : i64, scratch_operands = 0 : i64, tpu.core_type = #tpu.core_type<tc>, window_params = [{transform_indices = @transform_0, window_bounds = array<i64: 1, 8, 32>}, {pipeline_mode = #tpu.pipeline_mode<synchronous>, transform_indices = @transform_1, window_bounds = array<i64: 2, 4, 32, 32>}, {pipeline_mode = #tpu.pipeline_mode<synchronous>, transform_indices = @transform_2, window_bounds = array<i64: 2, 32, 64>}, {pipeline_mode = #tpu.pipeline_mode<synchronous>, transform_indices = @transform_3, window_bounds = array<i64: 2, 64, 32>}, {pipeline_mode = #tpu.pipeline_mode<synchronous>, transform_indices = @transform_4, window_bounds = array<i64: 2, 10, 64>}, {transform_indices = @transform_5, window_bounds = array<i64: 1, 8, 32>}]} {
    %c0 = arith.constant 0 : index
    %c0_0 = arith.constant 0 : index
    %c0_1 = arith.constant 0 : index
    %0 = vector.load %arg1[%c0, %c0_0, %c0_1] : memref<1x8x32xf32, #tpu.memory_space<vmem>>, vector<1x8x32xf32>
    %1 = vector.shape_cast %0 : vector<1x8x32xf32> to vector<8x32xf32>
    %c0_2 = arith.constant 0 : index
    %c0_3 = arith.constant 0 : index
    %c0_4 = arith.constant 0 : index
    %2 = vector.load %arg5[%c0_2, %c0_3, %c0_4] : memref<2x10x64xf32, #tpu.memory_space<vmem>>, vector<1x10x64xf32>
    %3 = vector.shape_cast %2 : vector<1x10x64xf32> to vector<10x64xf32>
    %4 = vector.extract_strided_slice %3 {offsets = [0, 0], sizes = [1, 32], strides = [1, 1]} : vector<10x64xf32> to vector<1x32xf32>
    %5 = vector.extract_strided_slice %3 {offsets = [1, 0], sizes = [1, 32], strides = [1, 1]} : vector<10x64xf32> to vector<1x32xf32>
    %6 = vector.extract_strided_slice %3 {offsets = [2, 0], sizes = [1, 32], strides = [1, 1]} : vector<10x64xf32> to vector<1x32xf32>
    %7 = vector.extract_strided_slice %3 {offsets = [3, 0], sizes = [1, 32], strides = [1, 1]} : vector<10x64xf32> to vector<1x32xf32>
    %8 = vector.extract_strided_slice %3 {offsets = [4, 0], sizes = [1, 32], strides = [1, 1]} : vector<10x64xf32> to vector<1x32xf32>
    %9 = vector.extract_strided_slice %3 {offsets = [5, 0], sizes = [1, 32], strides = [1, 1]} : vector<10x64xf32> to vector<1x32xf32>
    %10 = vector.extract_strided_slice %3 {offsets = [6, 0], sizes = [1, 32], strides = [1, 1]} : vector<10x64xf32> to vector<1x32xf32>
    %11 = vector.extract_strided_slice %3 {offsets = [7, 0], sizes = [1, 32], strides = [1, 1]} : vector<10x64xf32> to vector<1x32xf32>
    %12 = vector.extract_strided_slice %3 {offsets = [8, 0], sizes = [1, 32], strides = [1, 1]} : vector<10x64xf32> to vector<1x32xf32>
    %13 = vector.extract_strided_slice %3 {offsets = [9, 0], sizes = [1, 64], strides = [1, 1]} : vector<10x64xf32> to vector<1x64xf32>
    %c0_5 = arith.constant 0 : index
    %c0_6 = arith.constant 0 : index
    %c0_7 = arith.constant 0 : index
    %c0_8 = arith.constant 0 : index
    %14 = vector.load %arg2[%c0_5, %c0_6, %c0_7, %c0_8] : memref<2x4x32x32xf32, #tpu.memory_space<vmem>>, vector<1x4x32x32xf32>
    %15 = vector.shape_cast %14 : vector<1x4x32x32xf32> to vector<4x32x32xf32>
    %16 = vector.extract_strided_slice %15 {offsets = [0, 0, 0], sizes = [1, 32, 32], strides = [1, 1, 1]} : vector<4x32x32xf32> to vector<1x32x32xf32>
    %17 = vector.shape_cast %16 : vector<1x32x32xf32> to vector<32x32xf32>
    %18 = vector.extract_strided_slice %15 {offsets = [1, 0, 0], sizes = [1, 32, 32], strides = [1, 1, 1]} : vector<4x32x32xf32> to vector<1x32x32xf32>
    %19 = vector.shape_cast %18 : vector<1x32x32xf32> to vector<32x32xf32>
    %20 = vector.extract_strided_slice %15 {offsets = [2, 0, 0], sizes = [1, 32, 32], strides = [1, 1, 1]} : vector<4x32x32xf32> to vector<1x32x32xf32>
    %21 = vector.shape_cast %20 : vector<1x32x32xf32> to vector<32x32xf32>
    %22 = vector.extract_strided_slice %15 {offsets = [3, 0, 0], sizes = [1, 32, 32], strides = [1, 1, 1]} : vector<4x32x32xf32> to vector<1x32x32xf32>
    %23 = vector.shape_cast %22 : vector<1x32x32xf32> to vector<32x32xf32>
    %cst = arith.constant dense<0.000000e+00> : vector<8xf32>
    %24 = vector.multi_reduction <add>, %1, %cst [1] : vector<8x32xf32> to vector<8xf32>
    %25 = vector.shape_cast %24 : vector<8xf32> to vector<8x1xf32>
    %cst_9 = arith.constant 3.200000e+01 : f32
    %26 = vector.broadcast %cst_9 : f32 to vector<8x1xf32>
    %27 = arith.divf %25, %26 : vector<8x1xf32>
    %28 = vector.broadcast %27 : vector<8x1xf32> to vector<8x32xf32>
    %29 = arith.subf %1, %28 : vector<8x32xf32>
    %30 = arith.mulf %29, %29 : vector<8x32xf32>
    %cst_10 = arith.constant dense<0.000000e+00> : vector<8xf32>
    %31 = vector.multi_reduction <add>, %30, %cst_10 [1] : vector<8x32xf32> to vector<8xf32>
    %32 = vector.shape_cast %31 : vector<8xf32> to vector<8x1xf32>
    %cst_11 = arith.constant 3.200000e+01 : f32
    %33 = vector.broadcast %cst_11 : f32 to vector<8x1xf32>
    %34 = arith.divf %32, %33 : vector<8x1xf32>
    %35 = vector.broadcast %27 : vector<8x1xf32> to vector<8x32xf32>
    %36 = arith.subf %1, %35 : vector<8x32xf32>
    %cst_12 = arith.constant 9.99999997E-7 : f32
    %37 = vector.broadcast %cst_12 : f32 to vector<8x1xf32>
    %38 = arith.addf %34, %37 : vector<8x1xf32>
    %39 = math.rsqrt %38 : vector<8x1xf32>
    %40 = vector.broadcast %39 : vector<8x1xf32> to vector<8x32xf32>
    %41 = arith.mulf %36, %40 : vector<8x32xf32>
    %42 = vector.broadcast %4 : vector<1x32xf32> to vector<8x32xf32>
    %43 = arith.mulf %41, %42 : vector<8x32xf32>
    %44 = vector.broadcast %5 : vector<1x32xf32> to vector<8x32xf32>
    %45 = arith.addf %43, %44 : vector<8x32xf32>
    %cst_13 = arith.constant dense<0.000000e+00> : vector<8x32xf32>
    %46 = tpu.matmul %45, %17, %cst_13 {dimension_numbers = #tpu.dot_dimension_numbers<[1], [0], [0], [1], [0, 0, 1, 1], [], []>} : vector<8x32xf32>, vector<32x32xf32>, vector<8x32xf32> -> vector<8x32xf32>
    %47 = vector.broadcast %6 : vector<1x32xf32> to vector<8x32xf32>
    %48 = arith.addf %46, %47 : vector<8x32xf32>
    %cst_14 = arith.constant 0.176776692 : f32
    %49 = vector.broadcast %cst_14 : f32 to vector<8x32xf32>
    %50 = arith.mulf %48, %49 : vector<8x32xf32>
    %cst_15 = arith.constant dense<0.000000e+00> : vector<8x32xf32>
    %51 = tpu.matmul %45, %19, %cst_15 {dimension_numbers = #tpu.dot_dimension_numbers<[1], [0], [0], [1], [0, 0, 1, 1], [], []>} : vector<8x32xf32>, vector<32x32xf32>, vector<8x32xf32> -> vector<8x32xf32>
    %52 = vector.broadcast %7 : vector<1x32xf32> to vector<8x32xf32>
    %53 = arith.addf %51, %52 : vector<8x32xf32>
    %cst_16 = arith.constant dense<0.000000e+00> : vector<8x32xf32>
    %54 = tpu.matmul %45, %21, %cst_16 {dimension_numbers = #tpu.dot_dimension_numbers<[1], [0], [0], [1], [0, 0, 1, 1], [], []>} : vector<8x32xf32>, vector<32x32xf32>, vector<8x32xf32> -> vector<8x32xf32>
    %55 = vector.broadcast %8 : vector<1x32xf32> to vector<8x32xf32>
    %56 = arith.addf %54, %55 : vector<8x32xf32>
    %57 = tpu.transpose %50, [1, 0] : vector<8x32xf32> -> vector<32x8xf32>
    %58 = vector.shape_cast %57 : vector<32x8xf32> to vector<4x8x8xf32>
    %59 = tpu.transpose %53, [1, 0] : vector<8x32xf32> -> vector<32x8xf32>
    %60 = vector.shape_cast %59 : vector<32x8xf32> to vector<4x8x8xf32>
    %61 = tpu.transpose %56, [1, 0] : vector<8x32xf32> -> vector<32x8xf32>
    %62 = vector.shape_cast %61 : vector<32x8xf32> to vector<4x8x8xf32>
    "tpu.trace_start"() <{level = 10 : i32, message = "heq,hek->hqk"}> : () -> ()
    %cst_17 = arith.constant dense<0.000000e+00> : vector<4x8x8xf32>
    %63 = tpu.matmul %58, %60, %cst_17 {dimension_numbers = #tpu.dot_dimension_numbers<[1], [1], [2], [2], [0, 0, 0, 2, 1, 2], [0], [0]>} : vector<4x8x8xf32>, vector<4x8x8xf32>, vector<4x8x8xf32> -> vector<4x8x8xf32>
    "tpu.trace_stop"() : () -> ()
    %cst_18 = arith.constant dense<0xFF800000> : vector<4x8xf32>
    %64 = vector.multi_reduction <maximumf>, %63, %cst_18 [2] : vector<4x8x8xf32> to vector<4x8xf32>
    %65 = vector.shape_cast %64 : vector<4x8xf32> to vector<4x8x1xf32>
    %66 = vector.broadcast %65 : vector<4x8x1xf32> to vector<4x8x8xf32>
    %67 = arith.subf %63, %66 : vector<4x8x8xf32>
    %68 = math.exp %67 : vector<4x8x8xf32>
    %cst_19 = arith.constant dense<0.000000e+00> : vector<4x8xf32>
    %69 = vector.multi_reduction <add>, %68, %cst_19 [2] : vector<4x8x8xf32> to vector<4x8xf32>
    %70 = vector.shape_cast %69 : vector<4x8xf32> to vector<4x8x1xf32>
    %71 = vector.broadcast %70 : vector<4x8x1xf32> to vector<4x8x8xf32>
    %72 = arith.divf %68, %71 : vector<4x8x8xf32>
    "tpu.trace_start"() <{level = 10 : i32, message = "hqk,hek->hqe"}> : () -> ()
    %cst_20 = arith.constant dense<0.000000e+00> : vector<4x8x8xf32>
    %73 = tpu.matmul %72, %62, %cst_20 {dimension_numbers = #tpu.dot_dimension_numbers<[2], [2], [1], [1], [0, 0, 0, 1, 1, 1], [0], [0]>} : vector<4x8x8xf32>, vector<4x8x8xf32>, vector<4x8x8xf32> -> vector<4x8x8xf32>
    "tpu.trace_stop"() : () -> ()
    %74 = vector.shape_cast %23 : vector<32x32xf32> to vector<4x8x32xf32>
    "tpu.trace_start"() <{level = 10 : i32, message = "hqe,hed->hqd"}> : () -> ()
    %cst_21 = arith.constant dense<0.000000e+00> : vector<4x8x32xf32>
    %75 = tpu.matmul %73, %74, %cst_21 {dimension_numbers = #tpu.dot_dimension_numbers<[2], [1], [1], [2], [0, 0, 0, 1, 1, 2], [0], [0]>} : vector<4x8x8xf32>, vector<4x8x32xf32>, vector<4x8x32xf32> -> vector<4x8x32xf32>
    "tpu.trace_stop"() : () -> ()
    %cst_22 = arith.constant dense<0.000000e+00> : vector<8x32xf32>
    %76 = vector.multi_reduction <add>, %75, %cst_22 [0] : vector<4x8x32xf32> to vector<8x32xf32>
    %77 = arith.addf %1, %76 : vector<8x32xf32>
    %78 = vector.broadcast %9 : vector<1x32xf32> to vector<8x32xf32>
    %79 = arith.addf %77, %78 : vector<8x32xf32>
    %cst_23 = arith.constant dense<0.000000e+00> : vector<8xf32>
    %80 = vector.multi_reduction <add>, %79, %cst_23 [1] : vector<8x32xf32> to vector<8xf32>
    %81 = vector.shape_cast %80 : vector<8xf32> to vector<8x1xf32>
    %cst_24 = arith.constant 3.200000e+01 : f32
    %82 = vector.broadcast %cst_24 : f32 to vector<8x1xf32>
    %83 = arith.divf %81, %82 : vector<8x1xf32>
    %84 = vector.broadcast %83 : vector<8x1xf32> to vector<8x32xf32>
    %85 = arith.subf %79, %84 : vector<8x32xf32>
    %86 = arith.mulf %85, %85 : vector<8x32xf32>
    %cst_25 = arith.constant dense<0.000000e+00> : vector<8xf32>
    %87 = vector.multi_reduction <add>, %86, %cst_25 [1] : vector<8x32xf32> to vector<8xf32>
    %88 = vector.shape_cast %87 : vector<8xf32> to vector<8x1xf32>
    %cst_26 = arith.constant 3.200000e+01 : f32
    %89 = vector.broadcast %cst_26 : f32 to vector<8x1xf32>
    %90 = arith.divf %88, %89 : vector<8x1xf32>
    %91 = vector.broadcast %83 : vector<8x1xf32> to vector<8x32xf32>
    %92 = arith.subf %79, %91 : vector<8x32xf32>
    %cst_27 = arith.constant 9.99999997E-7 : f32
    %93 = vector.broadcast %cst_27 : f32 to vector<8x1xf32>
    %94 = arith.addf %90, %93 : vector<8x1xf32>
    %95 = math.rsqrt %94 : vector<8x1xf32>
    %96 = vector.broadcast %95 : vector<8x1xf32> to vector<8x32xf32>
    %97 = arith.mulf %92, %96 : vector<8x32xf32>
    %98 = vector.broadcast %10 : vector<1x32xf32> to vector<8x32xf32>
    %99 = arith.mulf %97, %98 : vector<8x32xf32>
    %100 = vector.broadcast %11 : vector<1x32xf32> to vector<8x32xf32>
    %101 = arith.addf %99, %100 : vector<8x32xf32>
    %c0_28 = arith.constant 0 : index
    %c0_29 = arith.constant 0 : index
    %c0_30 = arith.constant 0 : index
    %102 = vector.load %arg3[%c0_28, %c0_29, %c0_30] : memref<2x32x64xf32, #tpu.memory_space<vmem>>, vector<1x32x64xf32>
    %103 = vector.shape_cast %102 : vector<1x32x64xf32> to vector<32x64xf32>
    %cst_31 = arith.constant dense<0.000000e+00> : vector<8x64xf32>
    %104 = tpu.matmul %101, %103, %cst_31 {dimension_numbers = #tpu.dot_dimension_numbers<[1], [0], [0], [1], [0, 0, 1, 1], [], []>} : vector<8x32xf32>, vector<32x64xf32>, vector<8x64xf32> -> vector<8x64xf32>
    %105 = vector.broadcast %13 : vector<1x64xf32> to vector<8x64xf32>
    %106 = arith.addf %104, %105 : vector<8x64xf32>
    %cst_32 = arith.constant 0.000000e+00 : f32
    %107 = vector.broadcast %cst_32 : f32 to vector<8x64xf32>
    %108 = arith.maximumf %106, %107 : vector<8x64xf32>
    %c0_33 = arith.constant 0 : index
    %c0_34 = arith.constant 0 : index
    %c0_35 = arith.constant 0 : index
    %109 = vector.load %arg4[%c0_33, %c0_34, %c0_35] : memref<2x64x32xf32, #tpu.memory_space<vmem>>, vector<1x64x32xf32>
    %110 = vector.shape_cast %109 : vector<1x64x32xf32> to vector<64x32xf32>
    %cst_36 = arith.constant dense<0.000000e+00> : vector<8x32xf32>
    %111 = tpu.matmul %108, %110, %cst_36 {dimension_numbers = #tpu.dot_dimension_numbers<[1], [0], [0], [1], [0, 0, 1, 1], [], []>} : vector<8x64xf32>, vector<64x32xf32>, vector<8x32xf32> -> vector<8x32xf32>
    %112 = vector.broadcast %12 : vector<1x32xf32> to vector<8x32xf32>
    %113 = arith.addf %111, %112 : vector<8x32xf32>
    %114 = arith.addf %79, %113 : vector<8x32xf32>
    %c1 = arith.constant 1 : index
    %c0_37 = arith.constant 0 : index
    %c0_38 = arith.constant 0 : index
    %115 = vector.load %arg5[%c1, %c0_37, %c0_38] : memref<2x10x64xf32, #tpu.memory_space<vmem>>, vector<1x10x64xf32>
    %116 = vector.shape_cast %115 : vector<1x10x64xf32> to vector<10x64xf32>
    %117 = vector.extract_strided_slice %116 {offsets = [0, 0], sizes = [1, 32], strides = [1, 1]} : vector<10x64xf32> to vector<1x32xf32>
    %118 = vector.extract_strided_slice %116 {offsets = [1, 0], sizes = [1, 32], strides = [1, 1]} : vector<10x64xf32> to vector<1x32xf32>
    %119 = vector.extract_strided_slice %116 {offsets = [2, 0], sizes = [1, 32], strides = [1, 1]} : vector<10x64xf32> to vector<1x32xf32>
    %120 = vector.extract_strided_slice %116 {offsets = [3, 0], sizes = [1, 32], strides = [1, 1]} : vector<10x64xf32> to vector<1x32xf32>
    %121 = vector.extract_strided_slice %116 {offsets = [4, 0], sizes = [1, 32], strides = [1, 1]} : vector<10x64xf32> to vector<1x32xf32>
    %122 = vector.extract_strided_slice %116 {offsets = [5, 0], sizes = [1, 32], strides = [1, 1]} : vector<10x64xf32> to vector<1x32xf32>
    %123 = vector.extract_strided_slice %116 {offsets = [6, 0], sizes = [1, 32], strides = [1, 1]} : vector<10x64xf32> to vector<1x32xf32>
    %124 = vector.extract_strided_slice %116 {offsets = [7, 0], sizes = [1, 32], strides = [1, 1]} : vector<10x64xf32> to vector<1x32xf32>
    %125 = vector.extract_strided_slice %116 {offsets = [8, 0], sizes = [1, 32], strides = [1, 1]} : vector<10x64xf32> to vector<1x32xf32>
    %126 = vector.extract_strided_slice %116 {offsets = [9, 0], sizes = [1, 64], strides = [1, 1]} : vector<10x64xf32> to vector<1x64xf32>
    %c1_39 = arith.constant 1 : index
    %c0_40 = arith.constant 0 : index
    %c0_41 = arith.constant 0 : index
    %c0_42 = arith.constant 0 : index
    %127 = vector.load %arg2[%c1_39, %c0_40, %c0_41, %c0_42] : memref<2x4x32x32xf32, #tpu.memory_space<vmem>>, vector<1x4x32x32xf32>
    %128 = vector.shape_cast %127 : vector<1x4x32x32xf32> to vector<4x32x32xf32>
    %129 = vector.extract_strided_slice %128 {offsets = [0, 0, 0], sizes = [1, 32, 32], strides = [1, 1, 1]} : vector<4x32x32xf32> to vector<1x32x32xf32>
    %130 = vector.shape_cast %129 : vector<1x32x32xf32> to vector<32x32xf32>
    %131 = vector.extract_strided_slice %128 {offsets = [1, 0, 0], sizes = [1, 32, 32], strides = [1, 1, 1]} : vector<4x32x32xf32> to vector<1x32x32xf32>
    %132 = vector.shape_cast %131 : vector<1x32x32xf32> to vector<32x32xf32>
    %133 = vector.extract_strided_slice %128 {offsets = [2, 0, 0], sizes = [1, 32, 32], strides = [1, 1, 1]} : vector<4x32x32xf32> to vector<1x32x32xf32>
    %134 = vector.shape_cast %133 : vector<1x32x32xf32> to vector<32x32xf32>
    %135 = vector.extract_strided_slice %128 {offsets = [3, 0, 0], sizes = [1, 32, 32], strides = [1, 1, 1]} : vector<4x32x32xf32> to vector<1x32x32xf32>
    %136 = vector.shape_cast %135 : vector<1x32x32xf32> to vector<32x32xf32>
    %cst_43 = arith.constant dense<0.000000e+00> : vector<8xf32>
    %137 = vector.multi_reduction <add>, %114, %cst_43 [1] : vector<8x32xf32> to vector<8xf32>
    %138 = vector.shape_cast %137 : vector<8xf32> to vector<8x1xf32>
    %cst_44 = arith.constant 3.200000e+01 : f32
    %139 = vector.broadcast %cst_44 : f32 to vector<8x1xf32>
    %140 = arith.divf %138, %139 : vector<8x1xf32>
    %141 = vector.broadcast %140 : vector<8x1xf32> to vector<8x32xf32>
    %142 = arith.subf %114, %141 : vector<8x32xf32>
    %143 = arith.mulf %142, %142 : vector<8x32xf32>
    %cst_45 = arith.constant dense<0.000000e+00> : vector<8xf32>
    %144 = vector.multi_reduction <add>, %143, %cst_45 [1] : vector<8x32xf32> to vector<8xf32>
    %145 = vector.shape_cast %144 : vector<8xf32> to vector<8x1xf32>
    %cst_46 = arith.constant 3.200000e+01 : f32
    %146 = vector.broadcast %cst_46 : f32 to vector<8x1xf32>
    %147 = arith.divf %145, %146 : vector<8x1xf32>
    %148 = vector.broadcast %140 : vector<8x1xf32> to vector<8x32xf32>
    %149 = arith.subf %114, %148 : vector<8x32xf32>
    %cst_47 = arith.constant 9.99999997E-7 : f32
    %150 = vector.broadcast %cst_47 : f32 to vector<8x1xf32>
    %151 = arith.addf %147, %150 : vector<8x1xf32>
    %152 = math.rsqrt %151 : vector<8x1xf32>
    %153 = vector.broadcast %152 : vector<8x1xf32> to vector<8x32xf32>
    %154 = arith.mulf %149, %153 : vector<8x32xf32>
    %155 = vector.broadcast %117 : vector<1x32xf32> to vector<8x32xf32>
    %156 = arith.mulf %154, %155 : vector<8x32xf32>
    %157 = vector.broadcast %118 : vector<1x32xf32> to vector<8x32xf32>
    %158 = arith.addf %156, %157 : vector<8x32xf32>
    %cst_48 = arith.constant dense<0.000000e+00> : vector<8x32xf32>
    %159 = tpu.matmul %158, %130, %cst_48 {dimension_numbers = #tpu.dot_dimension_numbers<[1], [0], [0], [1], [0, 0, 1, 1], [], []>} : vector<8x32xf32>, vector<32x32xf32>, vector<8x32xf32> -> vector<8x32xf32>
    %160 = vector.broadcast %119 : vector<1x32xf32> to vector<8x32xf32>
    %161 = arith.addf %159, %160 : vector<8x32xf32>
    %cst_49 = arith.constant 0.176776692 : f32
    %162 = vector.broadcast %cst_49 : f32 to vector<8x32xf32>
    %163 = arith.mulf %161, %162 : vector<8x32xf32>
    %cst_50 = arith.constant dense<0.000000e+00> : vector<8x32xf32>
    %164 = tpu.matmul %158, %132, %cst_50 {dimension_numbers = #tpu.dot_dimension_numbers<[1], [0], [0], [1], [0, 0, 1, 1], [], []>} : vector<8x32xf32>, vector<32x32xf32>, vector<8x32xf32> -> vector<8x32xf32>
    %165 = vector.broadcast %120 : vector<1x32xf32> to vector<8x32xf32>
    %166 = arith.addf %164, %165 : vector<8x32xf32>
    %cst_51 = arith.constant dense<0.000000e+00> : vector<8x32xf32>
    %167 = tpu.matmul %158, %134, %cst_51 {dimension_numbers = #tpu.dot_dimension_numbers<[1], [0], [0], [1], [0, 0, 1, 1], [], []>} : vector<8x32xf32>, vector<32x32xf32>, vector<8x32xf32> -> vector<8x32xf32>
    %168 = vector.broadcast %121 : vector<1x32xf32> to vector<8x32xf32>
    %169 = arith.addf %167, %168 : vector<8x32xf32>
    %170 = tpu.transpose %163, [1, 0] : vector<8x32xf32> -> vector<32x8xf32>
    %171 = vector.shape_cast %170 : vector<32x8xf32> to vector<4x8x8xf32>
    %172 = tpu.transpose %166, [1, 0] : vector<8x32xf32> -> vector<32x8xf32>
    %173 = vector.shape_cast %172 : vector<32x8xf32> to vector<4x8x8xf32>
    %174 = tpu.transpose %169, [1, 0] : vector<8x32xf32> -> vector<32x8xf32>
    %175 = vector.shape_cast %174 : vector<32x8xf32> to vector<4x8x8xf32>
    "tpu.trace_start"() <{level = 10 : i32, message = "heq,hek->hqk"}> : () -> ()
    %cst_52 = arith.constant dense<0.000000e+00> : vector<4x8x8xf32>
    %176 = tpu.matmul %171, %173, %cst_52 {dimension_numbers = #tpu.dot_dimension_numbers<[1], [1], [2], [2], [0, 0, 0, 2, 1, 2], [0], [0]>} : vector<4x8x8xf32>, vector<4x8x8xf32>, vector<4x8x8xf32> -> vector<4x8x8xf32>
    "tpu.trace_stop"() : () -> ()
    %cst_53 = arith.constant dense<0xFF800000> : vector<4x8xf32>
    %177 = vector.multi_reduction <maximumf>, %176, %cst_53 [2] : vector<4x8x8xf32> to vector<4x8xf32>
    %178 = vector.shape_cast %177 : vector<4x8xf32> to vector<4x8x1xf32>
    %179 = vector.broadcast %178 : vector<4x8x1xf32> to vector<4x8x8xf32>
    %180 = arith.subf %176, %179 : vector<4x8x8xf32>
    %181 = math.exp %180 : vector<4x8x8xf32>
    %cst_54 = arith.constant dense<0.000000e+00> : vector<4x8xf32>
    %182 = vector.multi_reduction <add>, %181, %cst_54 [2] : vector<4x8x8xf32> to vector<4x8xf32>
    %183 = vector.shape_cast %182 : vector<4x8xf32> to vector<4x8x1xf32>
    %184 = vector.broadcast %183 : vector<4x8x1xf32> to vector<4x8x8xf32>
    %185 = arith.divf %181, %184 : vector<4x8x8xf32>
    "tpu.trace_start"() <{level = 10 : i32, message = "hqk,hek->hqe"}> : () -> ()
    %cst_55 = arith.constant dense<0.000000e+00> : vector<4x8x8xf32>
    %186 = tpu.matmul %185, %175, %cst_55 {dimension_numbers = #tpu.dot_dimension_numbers<[2], [2], [1], [1], [0, 0, 0, 1, 1, 1], [0], [0]>} : vector<4x8x8xf32>, vector<4x8x8xf32>, vector<4x8x8xf32> -> vector<4x8x8xf32>
    "tpu.trace_stop"() : () -> ()
    %187 = vector.shape_cast %136 : vector<32x32xf32> to vector<4x8x32xf32>
    "tpu.trace_start"() <{level = 10 : i32, message = "hqe,hed->hqd"}> : () -> ()
    %cst_56 = arith.constant dense<0.000000e+00> : vector<4x8x32xf32>
    %188 = tpu.matmul %186, %187, %cst_56 {dimension_numbers = #tpu.dot_dimension_numbers<[2], [1], [1], [2], [0, 0, 0, 1, 1, 2], [0], [0]>} : vector<4x8x8xf32>, vector<4x8x32xf32>, vector<4x8x32xf32> -> vector<4x8x32xf32>
    "tpu.trace_stop"() : () -> ()
    %cst_57 = arith.constant dense<0.000000e+00> : vector<8x32xf32>
    %189 = vector.multi_reduction <add>, %188, %cst_57 [0] : vector<4x8x32xf32> to vector<8x32xf32>
    %190 = arith.addf %114, %189 : vector<8x32xf32>
    %191 = vector.broadcast %122 : vector<1x32xf32> to vector<8x32xf32>
    %192 = arith.addf %190, %191 : vector<8x32xf32>
    %cst_58 = arith.constant dense<0.000000e+00> : vector<8xf32>
    %193 = vector.multi_reduction <add>, %192, %cst_58 [1] : vector<8x32xf32> to vector<8xf32>
    %194 = vector.shape_cast %193 : vector<8xf32> to vector<8x1xf32>
    %cst_59 = arith.constant 3.200000e+01 : f32
    %195 = vector.broadcast %cst_59 : f32 to vector<8x1xf32>
    %196 = arith.divf %194, %195 : vector<8x1xf32>
    %197 = vector.broadcast %196 : vector<8x1xf32> to vector<8x32xf32>
    %198 = arith.subf %192, %197 : vector<8x32xf32>
    %199 = arith.mulf %198, %198 : vector<8x32xf32>
    %cst_60 = arith.constant dense<0.000000e+00> : vector<8xf32>
    %200 = vector.multi_reduction <add>, %199, %cst_60 [1] : vector<8x32xf32> to vector<8xf32>
    %201 = vector.shape_cast %200 : vector<8xf32> to vector<8x1xf32>
    %cst_61 = arith.constant 3.200000e+01 : f32
    %202 = vector.broadcast %cst_61 : f32 to vector<8x1xf32>
    %203 = arith.divf %201, %202 : vector<8x1xf32>
    %204 = vector.broadcast %196 : vector<8x1xf32> to vector<8x32xf32>
    %205 = arith.subf %192, %204 : vector<8x32xf32>
    %cst_62 = arith.constant 9.99999997E-7 : f32
    %206 = vector.broadcast %cst_62 : f32 to vector<8x1xf32>
    %207 = arith.addf %203, %206 : vector<8x1xf32>
    %208 = math.rsqrt %207 : vector<8x1xf32>
    %209 = vector.broadcast %208 : vector<8x1xf32> to vector<8x32xf32>
    %210 = arith.mulf %205, %209 : vector<8x32xf32>
    %211 = vector.broadcast %123 : vector<1x32xf32> to vector<8x32xf32>
    %212 = arith.mulf %210, %211 : vector<8x32xf32>
    %213 = vector.broadcast %124 : vector<1x32xf32> to vector<8x32xf32>
    %214 = arith.addf %212, %213 : vector<8x32xf32>
    %c1_63 = arith.constant 1 : index
    %c0_64 = arith.constant 0 : index
    %c0_65 = arith.constant 0 : index
    %215 = vector.load %arg3[%c1_63, %c0_64, %c0_65] : memref<2x32x64xf32, #tpu.memory_space<vmem>>, vector<1x32x64xf32>
    %216 = vector.shape_cast %215 : vector<1x32x64xf32> to vector<32x64xf32>
    %cst_66 = arith.constant dense<0.000000e+00> : vector<8x64xf32>
    %217 = tpu.matmul %214, %216, %cst_66 {dimension_numbers = #tpu.dot_dimension_numbers<[1], [0], [0], [1], [0, 0, 1, 1], [], []>} : vector<8x32xf32>, vector<32x64xf32>, vector<8x64xf32> -> vector<8x64xf32>
    %218 = vector.broadcast %126 : vector<1x64xf32> to vector<8x64xf32>
    %219 = arith.addf %217, %218 : vector<8x64xf32>
    %cst_67 = arith.constant 0.000000e+00 : f32
    %220 = vector.broadcast %cst_67 : f32 to vector<8x64xf32>
    %221 = arith.maximumf %219, %220 : vector<8x64xf32>
    %c1_68 = arith.constant 1 : index
    %c0_69 = arith.constant 0 : index
    %c0_70 = arith.constant 0 : index
    %222 = vector.load %arg4[%c1_68, %c0_69, %c0_70] : memref<2x64x32xf32, #tpu.memory_space<vmem>>, vector<1x64x32xf32>
    %223 = vector.shape_cast %222 : vector<1x64x32xf32> to vector<64x32xf32>
    %cst_71 = arith.constant dense<0.000000e+00> : vector<8x32xf32>
    %224 = tpu.matmul %221, %223, %cst_71 {dimension_numbers = #tpu.dot_dimension_numbers<[1], [0], [0], [1], [0, 0, 1, 1], [], []>} : vector<8x64xf32>, vector<64x32xf32>, vector<8x32xf32> -> vector<8x32xf32>
    %225 = vector.broadcast %125 : vector<1x32xf32> to vector<8x32xf32>
    %226 = arith.addf %224, %225 : vector<8x32xf32>
    %227 = arith.addf %192, %226 : vector<8x32xf32>
    %c0_72 = arith.constant 0 : index
    %c0_73 = arith.constant 0 : index
    %c0_74 = arith.constant 0 : index
    %228 = vector.load %arg6[%c0_72, %c0_73, %c0_74] : memref<1x8x32xf32, #tpu.memory_space<vmem>>, vector<1x8x32xf32>
    %229 = vector.shape_cast %228 : vector<1x8x32xf32> to vector<8x32xf32>
    %230 = vector.shape_cast %227 : vector<8x32xf32> to vector<1x8x32xf32>
    tpu.vector_store %arg6[%c0_72, %c0_73, %c0_74], %230 {strides = array<i32>} : memref<1x8x32xf32, #tpu.memory_space<vmem>>, vector<1x8x32xf32>,
    return
  }
  func.func @transform_0(%arg0: i32) -> (i32, i32, i32) {
    %c0_i32 = arith.constant 0 : i32
    %c0_i32_0 = arith.constant 0 : i32
    %c0_i32_1 = arith.constant 0 : i32
    return %arg0, %c0_i32, %c0_i32_0 : i32, i32, i32
  }
  func.func @transform_1(%arg0: i32) -> (i32, i32, i32, i32) {
    %c0_i32 = arith.constant 0 : i32
    %c0_i32_0 = arith.constant 0 : i32
    %c0_i32_1 = arith.constant 0 : i32
    %c0_i32_2 = arith.constant 0 : i32
    %c0_i32_3 = arith.constant 0 : i32
    return %c0_i32, %c0_i32_0, %c0_i32_1, %c0_i32_2 : i32, i32, i32, i32
  }
  func.func @transform_2(%arg0: i32) -> (i32, i32, i32) {
    %c0_i32 = arith.constant 0 : i32
    %c0_i32_0 = arith.constant 0 : i32
    %c0_i32_1 = arith.constant 0 : i32
    %c0_i32_2 = arith.constant 0 : i32
    return %c0_i32, %c0_i32_0, %c0_i32_1 : i32, i32, i32
  }
  func.func @transform_3(%arg0: i32) -> (i32, i32, i32) {
    %c0_i32 = arith.constant 0 : i32
    %c0_i32_0 = arith.constant 0 : i32
    %c0_i32_1 = arith.constant 0 : i32
    %c0_i32_2 = arith.constant 0 : i32
    return %c0_i32, %c0_i32_0, %c0_i32_1 : i32, i32, i32
  }
  func.func @transform_4(%arg0: i32) -> (i32, i32, i32) {
    %c0_i32 = arith.constant 0 : i32
    %c0_i32_0 = arith.constant 0 : i32
    %c0_i32_1 = arith.constant 0 : i32
    %c0_i32_2 = arith.constant 0 : i32
    return %c0_i32, %c0_i32_0, %c0_i32_1 : i32, i32, i32
  }
  func.func @transform_5(%arg0: i32) -> (i32, i32, i32) {
    %c0_i32 = arith.constant 0 : i32
    %c0_i32_0 = arith.constant 0 : i32
    %c0_i32_1 = arith.constant 0 : i32
    return %arg0, %c0_i32, %c0_i32_0 : i32, i32, i32
  }
}

</mosaic_0001>

<bundles_post_ra>
// kernel: transformer_encoder.1
= control target key start
LH: loop header
LB: loop body
LE: loop exit
PB: predicated region body
PF: predicated region fallthrough
CT: control target
= control target key end

     0   :  { %10 = vsyncpa [#allocation3], 0  ;;  %s4803_s0 = inlined_call_operand.vmem [shape: f32[2,8,32], index: 0, kind: input, shape index: {}]   ;;  %s4804_s1 = inlined_call_operand.vmem [shape: f32[2,4,32,32], index: 1, kind: input, shape index: {}]   ;;  %s4805_s2 = inlined_call_operand.vmem [shape: f32[2,32,64], index: 2, kind: input, shape index: {}]   ;;  %s4806_s3 = inlined_call_operand.vmem [shape: f32[2,64,32], index: 3, kind: input, shape index: {}]   ;;  %s4807_s4 = inlined_call_operand.vmem [shape: f32[2,10,64], index: 4, kind: input, shape index: {}]   ;;  %s4808_s5 = inlined_call_operand.hbm [shape: f32[2,8,32], index: 5, kind: output, shape index: {}]  }
   0x1   :  { %12 = vsyncpa [#allocation3 + $0x1], 0  ;;  %s4243_s18 = smov 0   ;;  %s4245_s19 = smov 0  }
   0x2   :  { %s4247_s20 = smov 0   ;;  %s4249_s21 = smov 0  }
   0x3 LB: > { %s4264_s22 = sadd.s32 4294967295, %s4207_s21   ;;  %s3557_s23 = sadd.s32 4294967294, %s4207_s21   ;;  %s4207_s21 = sphi %s4249_s21, %s4814_s21   ;;  %s4203_s20 = sphi %s4247_s20, %s4813_s20   ;;  %s4199_s19 = sphi %s4245_s19, %s4812_s19   ;;  %s4195_s18 = sphi %s4243_s18, %s4811_s18  }
   0x4   : > { %s4268_s24 = sadd.s32 1, %s4207_s21   ;;  %s135_s25 = sadd.s32 1, %s4203_s20 }
   0x5   : > { %s132_s26 = ssub.s32 %s4207_s21, %s4268_s24  ;;  %p145_p0 = scmp.ne.s32.totalorder %s4203_s20, %s4199_s19 }
   0x6   : > { %p133_p1 = scmp.eq.s32.totalorder %s132_s26, 0  ;;  %p146_p2 = scmp.eq.s32.totalorder %s4264_s22, 1 }
   0x7   : > { %p151_p3 = scmp.ne.s32.totalorder %s4199_s19, %s4195_s18  ;;  %p152_p4 = scmp.eq.s32.totalorder %s3557_s23, 1 }
   0x8   : > { %s4279_s27 = scalar_select %p133_p1, %s4203_s20, %s135_s25  }
   0x9   : > { %p4281_p5 = por %p146_p2, %p145_p0  ;;  %p4285_p6 = por %p152_p4, %p151_p3 }
   0xa   : > { %p3560_p7 = scmp.ge.s32.totalorder %s4207_s21, 1  ;;  %p189_p8 = scmp.lt.s32.totalorder %s4207_s21, 3 }
   0xc   : > { %p190_p9 = pnand %p3560_p7, %p189_p8 }
   0xd   : > { %p216_p10 = scmp.lt.s32.totalorder (!%p190_p9), %s4264_s22, 1  ;;  %vm239_vm0 = vcmask (!%p190_p9), 261120   ;;  %v223_v7 = vld [vmem:[%s4804_s1] sm:$0xff] (!%p190_p9)  ;;  %v224_v8 = vld [vmem:[%s4804_s1 + $0x8] sm:$0xff] (!%p190_p9)  ;;  %v4209_v10 = vmov (!%p190_p9), 0.0|0.0   ;;  %v225_v13 = vld [vmem:[%s4804_s1 + $0x10] sm:$0xff] (!%p190_p9)  ;;  %v254_v23 = vlaneseq (!%p190_p9) }
   0xe   : > { %193 = sbr.rel (%p190_p9) target bundleno = 5078 (0x13d6), region = 40  ;;  %v227_v9 = vld [vmem:[%s4804_s1 + $0x20] sm:$0xff] (!%p190_p9)  ;;  %3991 = vmatprep.subr.bf16.mxu0 (!%p190_p9), %v4209_v10  ;;  %v3992_v11 = vpack.c.bf16 (!%p190_p9), %v224_v8, %v223_v7  ;;  %3997 = vmatprep.subr.bf16.mxu1 (!%p190_p9), %v4209_v10  ;;  %v228_v12 = vld [vmem:[%s4804_s1 + $0x28] sm:$0xff] (!%p190_p9)  ;;  %v226_v14 = vld [vmem:[%s4804_s1 + $0x18] sm:$0xff] (!%p190_p9)  ;;  %vm4210_vm1 = vmmov (!%p190_p9), 0   ;;  %v4211_v18 = vmov (!%p190_p9), 0.0  }
   0xf   : > { %v3998_v15 = vpack.c.bf16 (!%p190_p9), %v228_v12, %v227_v9  ;;  %v229_v16 = vld [vmem:[%s4804_s1 + $0x30] sm:$0xff] (!%p190_p9)  ;;  %v230_v17 = vld [vmem:[%s4804_s1 + $0x38] sm:$0xff] (!%p190_p9)  ;;  %3753 = vmatprep.mubr.msk.f32.mxu0 (!%p190_p9), %vm4210_vm1, %v4211_v18  ;;  %3764 = vmatprep.mubr.msk.f32.mxu1 (!%p190_p9), %vm4210_vm1, %v4211_v18  ;;  %v3995_v19 = vpack.c.bf16 (!%p190_p9), %v226_v14, %v225_v13  ;;  %v4336_v25 = vshrl.u32 (!%p190_p9), %v254_v23, 7  ;;  %v4344_v27 = vld [vmem:[%s4807_s4] sm:$0xff] (!%p190_p9)  ;;  %vm618_vm2 = vcmask (!%p190_p9), 64512   ;;  %s213_s23 = sand.u32 (!%p190_p9), 1, %s4199_s19  }
  0x10   : > { %3993 = vmatpush3.bf16.msra.mxu0 (!%p190_p9), %v3992_v11  ;;  %v4001_v20 = vpack.c.bf16 (!%p190_p9), %v230_v17, %v229_v16  ;;  %v231_v33 = vld [vmem:[%s4804_s1 + $0x40] sm:$0xff] (!%p190_p9)  ;;  %v232_v34 = vld [vmem:[%s4804_s1 + $0x48] sm:$0xff] (!%p190_p9)  ;;  %v233_v38 = vld [vmem:[%s4804_s1 + $0x50] sm:$0xff] (!%p190_p9)  ;;  %vm1777_vm3 = vcmask (!%p190_p9), 523264   ;;  %s3561_s25 = sshll.u32 (!%p190_p9), %s213_s23, 3  ;;  %s3636_s26 = sshll.u32 (!%p190_p9), %s4264_s22, 7 }
  0x11   : > { %3999 = vmatpush3.bf16.msra.mxu1 (!%p190_p9), %v3998_v15  ;;  %3994 = vmatprep.subr.bf16.mxu0 (!%p190_p9), %v4209_v10  ;;  %v4339_v26 = vsub.s32 (!%p190_p9), 0, %v4336_v25  ;;  %v4347_v28 = vsub.s32 (!%p190_p9), 1, %v4336_v25  ;;  %v4004_v36 = vpack.c.bf16 (!%p190_p9), %v232_v34, %v231_v33  ;;  %v234_v39 = vld [vmem:[%s4804_s1 + $0x58] sm:$0xff] (!%p190_p9)  ;;  %v266_v41 = vsub.s32 (!%p190_p9), 2, %v4336_v25  ;;  %s3485_s10 = scalar_lea.sflag (!%p190_p9), [#allocation3], %s213_s23  ;;  %s4212_s11 = smov (!%p190_p9), [#allocation2]  }
  0x12   : > { %4000 = vmatprep.subr.bf16.mxu1 (!%p190_p9), %v4209_v10  ;;  %v4007_v40 = vpack.c.bf16 (!%p190_p9), %v234_v39, %v233_v38  ;;  %v344_v49 = vsub.s32 (!%p190_p9), 3, %v4336_v25  ;;  %v418_v16 = vsub.s32 (!%p190_p9), 4, %v4336_v25  ;;  %s4149_s12 = sshll.u32 (!%p190_p9), %s4212_s11, 4  ;;  %s4150_s12 = int_to_ptr.vmem [resolvable:$false] %s4149_s12 }
  0x13   : > { %v257_v29 = vrot.slane (!%p190_p9), %v4344_v27, %v4339_v26  ;;  %v262_v32 = vrot.slane (!%p190_p9), %v4344_v27, %v4347_v28  ;;  %v267_v42 = vrot.slane (!%p190_p9), %v4344_v27, %v266_v41  ;;  %s4151_s13 = scalar_lea.vmem (!%p190_p9), %s4150_s12, 256 }
  0x14   : > { %3996 = vmatpush3.bf16.msra.mxu0 (!%p190_p9), %v3995_v19  ;;  %v345_v52 = vrot.slane (!%p190_p9), %v4344_v27, %v344_v49  ;;  %v419_v17 = vrot.slane (!%p190_p9), %v4344_v27, %v418_v16 }
  0x15   : > { %s217_s30 = scalar_select %p216_p10, %s4264_s22, 1  ;;  %4002 = vmatpush3.bf16.msra.mxu1 %v4001_v20  ;;  %4003 = vmatprep.subr.bf16.mxu0 %v4209_v10 }
  0x16   : > { %3783 = vmatprep.subr.mxu1 %v4211_v18 }
  0x17   : > { %s3562_s6 = sshll.u32 %s217_s30, 3  ;;  %s215_s30 = scalar_lea.vmem [#allocation2], %s3561_s25 }
  0x18   : > { %s219_s9 = scalar_lea.vmem %s4803_s0, %s3562_s6  ;;  %s3498_s6 = sshll.u32 %s215_s30, 4  ;;  %s4762_s6 = int_to_ptr.vmem [resolvable:$true] %s3498_s6 }
  0x19   : > { %v4296_v0 = vld [vmem:[%s219_s9] sm:$0xff]  ;;  %s4760_s9 = scalar_lea.hbm %s4808_s5, %s3636_s26  ;;  %s4145_s22 = scalar_lea.vmem %s4762_s6, 128 }
  0x1a   : > { %v240_v1 = vsel %vm239_vm0, %v4296_v0, 0.0  ;;  %p4146_p11 = scmp.ne.s32.totalorder %s4762_s6, %s4145_s22  ;;  %p4152_p0 = scmp.lt.s32.totalorder %s4762_s6, %s4150_s12 }
  0x1b   : > { %241 = vadd.xlane.f32.xlu0 %v240_v1  ;;  %p4153_p1 = scmp.lt.s32.totalorder %s4151_s13, %s4145_s22 }
  0x1c   : > { %p4147_p12 = pnand %p4146_p11, %p4281_p5 }
  0x1d   : > { %p4154_p2 = por %p4153_p1, %p4152_p0 }
  0x1e   : > { %p4148_p13 = pneg %p4147_p12 }
  0x20   : > { %p4155_p3 = pnand %p4154_p2, %p4148_p13 }
  0xa8   : > { %v242_v2 = vpop.xlane.xlu0 %241 }
  0xa9   : > { %v244_v3 = vmul.f32 0.03125, %v242_v2 }
  0xab   : > { %v245_v4 = vsub.f32 %v4296_v0, %v244_v3 }
  0xad   : > { %v246_v5 = vmul.f32 %v245_v4, %v245_v4 }
  0xaf   : > { %v247_v6 = vsel %vm239_vm0, %v246_v5, 0.0 }
  0xb0   : > { %248 = vadd.xlane.f32.xlu0 %v247_v6 }
 0x13d   : > { %v249_v21 = vpop.xlane.xlu0 %248 }
 0x13e   : > { %v250_v22 = vmul.f32 0.03125, %v249_v21 }
 0x140   : > { %v251_v24 = vadd.f32 1e-06, %v250_v22 }
 0x142   : > { %4105 = vrsqrt.f32 %v251_v24 }
 0x14c   : > { %v4106_v30 = vpop.eup %4105 }
 0x14d   : > { %v253_v31 = vmul.f32 %v4106_v30, %v245_v4 }
 0x14f   : > { %v258_v35 = vmul.f32 %v257_v29, %v253_v31 }
 0x151   : > { %v263_v37 = vadd.f32 %v262_v32, %v258_v35 }
 0x153   : > { %3754 = vmatmul.mubr.msk.f32.vlgmr.msra.gmra.mrb[0].mxu0 %vm239_vm0, %v263_v37  ;;  %3765 = vmatmul.mubr.msk.f32.vlgmr.msra.gmra.mrb[0].mxu1 %vm239_vm0, %v263_v37 }
 0x154   : > { %4005 = vmatpush3.bf16.msra.mxu0 %v4004_v36  ;;  %3775 = vmatprep.mubr.msk.f32.mxu0 %vm4210_vm1, %v4211_v18 }
 0x155   : > { %4006 = vmatprep.subr.bf16.mxu0 %v4209_v10  ;;  %3785 = vmatprep.mubr.msk.f32.mxu1 %vm4210_vm1, %v4211_v18 }
 0x158   : > { %4008 = vmatpush3.bf16.msra.mxu0 %v4007_v40 }
 0x159   : > { %3778 = vmatprep.subr.mxu0 %v4211_v18 }
 0x15b   : > { %3776 = vmatmul.mubr.msk.f32.vlgmr.msra.gmra.mrb[2].mxu0 %vm239_vm0, %v263_v37 }
 0x15c   : > { %3780 = vmatprep.mubr.msk.f32.mxu0 %vm4210_vm1, %v4211_v18 }
 0x226   : > { %v337_v43 = vpop.f32.mrb[0].mxu0  ;;  %v412_v44 = vpop.f32.mrb[0].mxu1 }
 0x227   : > { %v3755_v45 = vpop.f32.mrb[1].mxu0  ;;  %v3766_v46 = vpop.f32.mrb[1].mxu1  ;;  %v338_v47 = vadd.f32 %v337_v43, %v267_v42  ;;  %v413_v53 = vadd.f32 %v412_v44, %v345_v52 }
 0x229   : > { %v341_v48 = vmul.f32 0.17677669, %v338_v47 }
 0x22b   : > { %490 = vxpose.xlu1.b32.start.end [1/1] (short) (narrow) %v341_v48, 32 }
 0x22e   : > { %v486_v50 = vpop.f32.mrb[2].mxu0 }
 0x22f   : > { %v3777_v51 = vpop.f32.mrb[3].mxu0  ;;  %v487_v19 = vadd.f32 %v486_v50, %v419_v17 }
 0x238   : > { %522 = vxpose.xlu1.b32.start.end [1/1] (short) (narrow) %v413_v53, 32 }
 0x2ab   : > { %v506_v54 = vpop.trf.xlu1 }
 0x2ac   : > { %586 = vxpose.xlu0.b32.start.end [1/1] (short) (narrow) %v506_v54, 8 }
 0x2af   : > { %v507_v55 = vpop.trf.xlu1 }
 0x2b0   : > { %692 = vxpose.xlu1.b32.start.end [1/1] (short) (narrow) %v507_v55, 8 }
 0x2b3   : > { %v508_v56 = vpop.trf.xlu1 }
 0x2b4   : > { %797 = vxpose.xlu1.b32.start.end [1/1] (short) (narrow) %v508_v56, 8 }
 0x2b7   : > { %v509_v57 = vpop.trf.xlu1 }
 0x2b8   : > { %902 = vxpose.xlu1.b32.start.end [1/1] (short) (narrow) %v509_v57, 8 }
 0x2bb   : > { %v538_v58 = vpop.trf.xlu1 }
 0x2bc   : > { %3779 = vmatpush3.msra.mxu0 %v538_v58 }
 0x2bd   : > { %3788 = vmatprep.subr.mxu0 %v4211_v18 }
 0x2bf   : > { %v539_v59 = vpop.trf.xlu1 }
 0x2c0   : > { %3784 = vmatpush3.msra.mxu1 %v539_v59 }
 0x2c1   : > { %3793 = vmatprep.subr.mxu1 %v4211_v18 }
 0x2c3   : > { %v540_v60 = vpop.trf.xlu1 }
 0x2c7   : > { %v541_v61 = vpop.trf.xlu1 }
 0x32c   : > { %v602_v62 = vpop.trf.xlu0 }
 0x32d   : > { %3781 = vmatmul.mubr.msk.f32.vlgmr.msra.gmra.mrb[4].mxu0 %vm618_vm2, %v602_v62  ;;  %v235_v62 = vld [vmem:[%s4804_s1 + $0x60] sm:$0xff] }
 0x32e   : > { %3789 = vmatpush3.msra.mxu0 %v540_v60  ;;  %3790 = vmatprep.mubr.msk.f32.mxu0 %vm4210_vm1, %v4211_v18 }
 0x32f   : > { %3798 = vmatprep.subr.mxu0 %v4211_v18 }
 0x330   : > { %v708_v63 = vpop.trf.xlu1 }
 0x331   : > { %3786 = vmatmul.mubr.msk.f32.vlgmr.msra.gmra.mrb[2].mxu1 %vm618_vm2, %v708_v63  ;;  %v236_v63 = vld [vmem:[%s4804_s1 + $0x68] sm:$0xff] }
 0x332   : > { %3794 = vmatpush3.msra.mxu1 %v541_v61  ;;  %3795 = vmatprep.mubr.msk.f32.mxu1 %vm4210_vm1, %v4211_v18 }
 0x333   : > { %3803 = vmatprep.subr.mxu1 %v4211_v18 }
 0x334   : > { %v813_v1 = vpop.trf.xlu1 }
 0x335   : > { %3791 = vmatmul.mubr.msk.f32.vlgmr.msra.gmra.mrb[6].mxu0 %vm618_vm2, %v813_v1  ;;  %v237_v1 = vld [vmem:[%s4804_s1 + $0x70] sm:$0xff] }
 0x336   : > { %3800 = vmatprep.mubr.msk.f32.mxu0 %vm4210_vm1, %v4211_v18 }
 0x338   : > { %v918_v2 = vpop.trf.xlu1 }
 0x339   : > { %3796 = vmatmul.mubr.msk.f32.vlgmr.msra.gmra.mrb[4].mxu1 %vm618_vm2, %v918_v2 }
 0x33a   : > { %3805 = vmatprep.mubr.msk.f32.mxu1 %vm4210_vm1, %v4211_v18 }
 0x400   : > { %v688_v3 = vpop.f32.mrb[4].mxu0 }
 0x401   : > { %v3782_v4 = vpop.f32.mrb[5].mxu0  ;;  %v1007_v5 = vsel %vm618_vm2, %v688_v3, -inf }
 0x402   : > { %1008 = vmax.xlane.f32.xlu1 %v1007_v5  ;;  %v238_v4 = vld [vmem:[%s4804_s1 + $0x78] sm:$0xff] }
 0x404   : > { %v793_v6 = vpop.f32.mrb[2].mxu1 }
 0x405   : > { %v3787_v7 = vpop.f32.mrb[3].mxu1  ;;  %v1010_v8 = vsel %vm618_vm2, %v793_v6, -inf }
 0x406   : > { %1011 = vmax.xlane.f32.xlu0 %v1010_v8 }
 0x408   : > { %v898_v9 = vpop.f32.mrb[6].mxu0 }
 0x409   : > { %v3792_v11 = vpop.f32.mrb[7].mxu0  ;;  %v1013_v12 = vsel %vm618_vm2, %v898_v9, -inf }
 0x40a   : > { %1014 = vmax.xlane.f32.xlu1 %v1013_v12 }
 0x40c   : > { %v1003_v13 = vpop.f32.mrb[4].mxu1 }
 0x40d   : > { %v3797_v14 = vpop.f32.mrb[5].mxu1  ;;  %v1016_v15 = vsel %vm618_vm2, %v1003_v13, -inf }
 0x40e   : > { %1017 = vmax.xlane.f32.xlu1 %v1016_v15 }
 0x433   : > { %554 = vxpose.xlu0.b32.start.end [1/1] (short) (narrow) %v487_v19, 32 }
 0x48f   : > { %v1009_v20 = vpop.xlane.xlu1 %1008 }
 0x490   : > { %v1019_v21 = vsub.f32 %v688_v3, %v1009_v20 }
 0x492   : > { %v1023_v22 = vmul.f32 1.442695, %v1019_v21 }
 0x493   : > { %v1012_v23 = vpop.xlane.xlu0 %1011 }
 0x494   : > { %4107 = vpow2.f32 %v1023_v22  ;;  %v1020_v24 = vsub.f32 %v793_v6, %v1012_v23 }
 0x496   : > { %v1025_v29 = vmul.f32 1.442695, %v1020_v24 }
 0x497   : > { %v1015_v30 = vpop.xlane.xlu1 %1014 }
 0x498   : > { %4109 = vpow2.f32 %v1025_v29  ;;  %v1021_v31 = vsub.f32 %v898_v9, %v1015_v30  ;;  %v1657_v29 = vsub.s32 5, %v4336_v25 }
 0x49a   : > { %v1027_v32 = vmul.f32 1.442695, %v1021_v31 }
 0x49b   : > { %v1018_v33 = vpop.xlane.xlu1 %1017 }
 0x49c   : > { %4111 = vpow2.f32 %v1027_v32  ;;  %v1022_v34 = vsub.f32 %v1003_v13, %v1018_v33 }
 0x49e   : > { %v4108_v35 = vpop.eup %4107  ;;  %v1029_v36 = vmul.f32 1.442695, %v1022_v34  ;;  %v1658_v34 = vrot.slane %v4344_v27, %v1657_v29 }
 0x49f   : > { %v1031_v37 = vsel %vm618_vm2, %v4108_v35, 0.0 }
 0x4a0   : > { %4113 = vpow2.f32 %v1029_v36  ;;  %1032 = vadd.xlane.f32.xlu1 %v1031_v37 }
 0x4a2   : > { %v4110_v38 = vpop.eup %4109 }
 0x4a3   : > { %v1034_v39 = vsel %vm618_vm2, %v4110_v38, 0.0 }
 0x4a4   : > { %1035 = vadd.xlane.f32.xlu1 %v1034_v39 }
 0x4a6   : > { %v4112_v40 = vpop.eup %4111 }
 0x4a7   : > { %v1037_v42 = vsel %vm618_vm2, %v4112_v40, 0.0 }
 0x4a8   : > { %1038 = vadd.xlane.f32.xlu1 %v1037_v42 }
 0x4aa   : > { %v4114_v43 = vpop.eup %4113 }
 0x4ab   : > { %v1040_v44 = vsel %vm618_vm2, %v4114_v43, 0.0 }
 0x4ac   : > { %1041 = vadd.xlane.f32.xlu1 %v1040_v44  ;;  %v1683_v44 = vld [vmem:[%s4805_s2] sm:$0xff] }
 0x4b3   : > { %v570_v45 = vpop.trf.xlu0 }
 0x4b4   : > { %3799 = vmatpush3.xpose.msk.msra.mxu0 %vm618_vm2, %v570_v45 }
 0x4b5   : > { %3808 = vmatprep.subr.mxu0 %v4211_v18 }
 0x4b7   : > { %v571_v46 = vpop.trf.xlu0 }
 0x4b8   : > { %3804 = vmatpush3.xpose.msk.msra.mxu1 %vm618_vm2, %v571_v46  ;;  %v1685_v46 = vld [vmem:[%s4805_s2 + $0x10] sm:$0xff] }
 0x4b9   : > { %3813 = vmatprep.subr.mxu1 %v4211_v18 }
 0x4bb   : > { %v572_v51 = vpop.trf.xlu0 }
 0x4bf   : > { %v573_v57 = vpop.trf.xlu0 }
 0x52d   : > { %v1033_v47 = vpop.xlane.xlu1 %1032 }
 0x52e   : > { %4115 = vrcp.f32 %v1033_v47  ;;  %v1686_v47 = vld [vmem:[%s4805_s2 + $0x18] sm:$0xff] }
 0x531   : > { %v1036_v48 = vpop.xlane.xlu1 %1035 }
 0x532   : > { %4117 = vrcp.f32 %v1036_v48  ;;  %v4013_v48 = vpack.c.bf16 %v1686_v47, %v1685_v46 }
 0x535   : > { %v1039_v50 = vpop.xlane.xlu1 %1038 }
 0x536   : > { %4119 = vrcp.f32 %v1039_v50  ;;  %v1765_v50 = vld [vmem:[%s4806_s3] sm:$0xff] }
 0x538   : > { %v4116_v52 = vpop.eup %4115 }
 0x539   : > { %v1044_v53 = vmul.f32 %v4116_v52, %v4108_v35  ;;  %v1042_v54 = vpop.xlane.xlu1 %1041  ;;  %v1767_v52 = vld [vmem:[%s4806_s3 + $0x10] sm:$0xff] }
 0x53a   : > { %4121 = vrcp.f32 %v1042_v54  ;;  %v1768_v54 = vld [vmem:[%s4806_s3 + $0x18] sm:$0xff] }
 0x53b   : > { %3801 = vmatmul.mubr.msk.f32.vlgmr.msra.gmra.mrb[8].mxu0 %vm618_vm2, %v1044_v53 }
 0x53c   : > { %v4118_v55 = vpop.eup %4117  ;;  %3809 = vmatpush3.xpose.msk.msra.mxu0 %vm618_vm2, %v572_v51  ;;  %3810 = vmatprep.mubr.msk.f32.mxu0 %vm4210_vm1, %v4211_v18  ;;  %v1766_v51 = vld [vmem:[%s4806_s3 + $0x8] sm:$0xff] }
 0x53d   : > { %v1046_v56 = vmul.f32 %v4118_v55, %v4110_v38  ;;  %3818 = vmatprep.subr.mxu0 %v4211_v18  ;;  %v4016_v53 = vpack.c.bf16 %v1766_v51, %v1765_v50  ;;  %v4019_v55 = vpack.c.bf16 %v1768_v54, %v1767_v52  ;;  %v4574_v50 = vld [vmem:[%s4807_s4 + $0x10] sm:$0xff] }
 0x53e   : > { %v1888_v51 = vrot.slane %v4574_v50, %v4339_v26  ;;  %v1893_v54 = vrot.slane %v4574_v50, %v4347_v28 }
 0x53f   : > { %3806 = vmatmul.mubr.msk.f32.vlgmr.msra.gmra.mrb[6].mxu1 %vm618_vm2, %v1046_v56  ;;  %v1769_v56 = vld [vmem:[%s4806_s3 + $0x20] sm:$0xff] }
 0x540   : > { %v4120_v58 = vpop.eup %4119  ;;  %3814 = vmatpush3.xpose.msk.msra.mxu1 %vm618_vm2, %v573_v57  ;;  %3815 = vmatprep.mubr.msk.f32.mxu1 %vm4210_vm1, %v4211_v18  ;;  %v1770_v57 = vld [vmem:[%s4806_s3 + $0x28] sm:$0xff] }
 0x541   : > { %v1048_v59 = vmul.f32 %v4120_v58, %v4112_v40  ;;  %3823 = vmatprep.subr.mxu1 %v4211_v18  ;;  %v4022_v58 = vpack.c.bf16 %v1770_v57, %v1769_v56  ;;  %v3591_v56 = vld [vmem:[%s4804_s1 + $0xa8] sm:$0xff] }
 0x543   : > { %3811 = vmatmul.mubr.msk.f32.vlgmr.msra.gmra.mrb[10].mxu0 %vm618_vm2, %v1048_v59 }
 0x544   : > { %v4122_v60 = vpop.eup %4121  ;;  %3820 = vmatprep.mubr.msk.f32.mxu0 %vm4210_vm1, %v4211_v18  ;;  %3819 = vmatpush3.msra.mxu0 %v235_v62  ;;  %v1675_v62 = vsub.s32 6, %v4336_v25 }
 0x545   : > { %v1050_v61 = vmul.f32 %v4122_v60, %v4114_v43  ;;  %3828 = vmatprep.subr.mxu0 %v4211_v18 }
 0x547   : > { %3816 = vmatmul.mubr.msk.f32.vlgmr.msra.gmra.mrb[8].mxu1 %vm618_vm2, %v1050_v61 }
 0x548   : > { %3825 = vmatprep.mubr.msk.f32.mxu1 %vm4210_vm1, %v4211_v18  ;;  %3824 = vmatpush3.msra.mxu1 %v236_v63  ;;  %v1680_v63 = vsub.s32 7, %v4336_v25  ;;  %v3585_v25 = vld [vmem:[%s4807_s4 + $0x18] sm:$0x3] }
 0x549   : > { %3833 = vmatprep.subr.mxu1 %v4211_v18 }
 0x60e   : > { %v1123_v2 = vpop.f32.mrb[8].mxu0 }
 0x60f   : > { %v3802_v3 = vpop.f32.mrb[9].mxu0  ;;  %3821 = vmatmul.mubr.msk.f32.vlgmr.msra.gmra.mrb[12].mxu0 %vm618_vm2, %v1123_v2 }
 0x610   : > { %3829 = vmatpush3.msra.mxu0 %v237_v1  ;;  %3830 = vmatprep.mubr.msk.f32.mxu0 %vm4210_vm1, %v4211_v18  ;;  %v1676_v1 = vrot.slane %v4344_v27, %v1675_v62 }
 0x611   : > { %4009 = vmatprep.subr.bf16.mxu0 %v4209_v10 }
 0x612   : > { %v1199_v5 = vpop.f32.mrb[6].mxu1 }
 0x613   : > { %v3807_v6 = vpop.f32.mrb[7].mxu1  ;;  %3826 = vmatmul.mubr.msk.f32.vlgmr.msra.gmra.mrb[10].mxu1 %vm618_vm2, %v1199_v5 }
 0x614   : > { %3834 = vmatpush3.msra.mxu1 %v238_v4  ;;  %3835 = vmatprep.mubr.msk.f32.mxu1 %vm4210_vm1, %v4211_v18  ;;  %v1681_v4 = vrot.slane %v4344_v27, %v1680_v63  ;;  %v222_v27 = vld [vmem:[%s4807_s4 + $0x8] sm:$0x3] }
 0x615   : > { %4015 = vmatprep.subr.bf16.mxu1 %v4209_v10 }
 0x616   : > { %v1275_v7 = vpop.f32.mrb[10].mxu0 }
 0x617   : > { %v3812_v8 = vpop.f32.mrb[11].mxu0  ;;  %3831 = vmatmul.mubr.msk.f32.vlgmr.msra.gmra.mrb[14].mxu0 %vm618_vm2, %v1275_v7  ;;  %v1771_v7 = vld [vmem:[%s4806_s3 + $0x30] sm:$0xff] }
 0x618   : > { %3846 = vmatprep.mubr.msk.f32.mxu0 %vm4210_vm1, %v4211_v18  ;;  %v1772_v8 = vld [vmem:[%s4806_s3 + $0x38] sm:$0xff] }
 0x61a   : > { %v1351_v9 = vpop.f32.mrb[8].mxu1 }
 0x61b   : > { %v3817_v11 = vpop.f32.mrb[9].mxu1  ;;  %3836 = vmatmul.mubr.msk.f32.vlgmr.msra.gmra.mrb[12].mxu1 %vm618_vm2, %v1351_v9  ;;  %v4025_v9 = vpack.c.bf16 %v1772_v8, %v1771_v7 }
 0x61c   : > { %3865 = vmatprep.mubr.msk.f32.mxu1 %vm4210_vm1, %v4211_v18  ;;  %4017 = vmatpush3.bf16.msra.mxu1 %v4016_v53  ;;  %v1690_v11 = vrot.slane %v222_v27, %v4347_v28 }
 0x61d   : > { %4018 = vmatprep.subr.bf16.mxu1 %v4209_v10 }
 0x620   : > { %4020 = vmatpush3.bf16.msra.mxu1 %v4019_v55  ;;  %v3590_v55 = vld [vmem:[%s4804_s1 + $0xa0] sm:$0xff] }
 0x621   : > { %4021 = vmatprep.subr.bf16.mxu1 %v4209_v10 }
 0x624   : > { %4023 = vmatpush3.bf16.msra.mxu1 %v4022_v58  ;;  %v4034_v58 = vpack.c.bf16 %v3591_v56, %v3590_v55 }
 0x625   : > { %4024 = vmatprep.subr.bf16.mxu1 %v4209_v10 }
 0x628   : > { %4026 = vmatpush3.bf16.msra.mxu1 %v4025_v9  ;;  %v1976_v9 = vrot.slane %v4574_v50, %v344_v49 }
 0x629   : > { %4039 = vmatprep.subr.bf16.mxu1 %v4209_v10 }
 0x6e2   : > { %v1424_v12 = vpop.f32.mrb[12].mxu0 }
 0x6e3   : > { %v3822_v13 = vpop.f32.mrb[13].mxu0  ;;  %v1647_v15 = vsel %vm239_vm0, %v1424_v12, 0.0 }
 0x6e6   : > { %v1497_v14 = vpop.f32.mrb[10].mxu1 }
 0x6e7   : > { %v1648_v17 = vsel %vm239_vm0, %v1497_v14, 0.0  ;;  %v3827_v19 = vpop.f32.mrb[11].mxu1 }
 0x6e8   : > { %v1649_v20 = vadd.f32 %v1648_v17, %v1647_v15  ;;  %v1776_v17 = vrot.slane %v222_v27, %v4339_v26 }
 0x6ea   : > { %v1570_v21 = vpop.f32.mrb[14].mxu0 }
 0x6eb   : > { %v1650_v22 = vsel %vm239_vm0, %v1570_v21, 0.0  ;;  %v3832_v23 = vpop.f32.mrb[15].mxu0 }
 0x6ec   : > { %v1651_v24 = vadd.f32 %v1650_v22, %v1649_v20 }
 0x6ee   : > { %v1643_v30 = vpop.f32.mrb[12].mxu1 }
 0x6ef   : > { %v1652_v31 = vsel %vm239_vm0, %v1643_v30, 0.0  ;;  %v3837_v32 = vpop.f32.mrb[13].mxu1 }
 0x6f0   : > { %v1653_v33 = vadd.f32 %v1652_v31, %v1651_v24 }
 0x6f2   : > { %v1654_v35 = vadd.f32 %v1653_v33, %v4296_v0  ;;  %v1684_v0 = vld [vmem:[%s4805_s2 + $0x8] sm:$0xff] }
 0x6f3   : > { %v4010_v45 = vpack.c.bf16 %v1684_v0, %v1683_v44  ;;  %v3597_v0 = vld [vmem:[%s4804_s1 + $0xd8] sm:$0xff] }
 0x6f4   : > { %v4469_v36 = vadd.f32 %v1658_v34, %v1654_v35  ;;  %v3586_v34 = vld [vmem:[%s4804_s1 + $0x80] sm:$0xff]  ;;  %v3587_v35 = vld [vmem:[%s4804_s1 + $0x88] sm:$0xff] }
 0x6f5   : > { %4011 = vmatpush3.bf16.msra.mxu0 %v4010_v45 }
 0x6f6   : > { %v1660_v37 = vsel %vm239_vm0, %v4469_v36, 0.0  ;;  %4012 = vmatprep.subr.bf16.mxu0 %v4209_v10 }
 0x6f7   : > { %1661 = vadd.xlane.f32.xlu1 %v1660_v37  ;;  %v3594_v37 = vld [vmem:[%s4804_s1 + $0xc0] sm:$0xff] }
 0x6f9   : > { %4014 = vmatpush3.bf16.msra.mxu0 %v4013_v48 }
 0x6fa   : > { %4027 = vmatprep.subr.bf16.mxu0 %v4209_v10 }
 0x784   : > { %v1662_v38 = vpop.xlane.xlu1 %1661 }
 0x785   : > { %v1663_v39 = vmul.f32 0.03125, %v1662_v38  ;;  %v3595_v38 = vld [vmem:[%s4804_s1 + $0xc8] sm:$0xff] }
 0x787   : > { %v1664_v40 = vsub.f32 %v4469_v36, %v1663_v39  ;;  %v4040_v39 = vpack.c.bf16 %v3595_v38, %v3594_v37 }
 0x789   : > { %v1665_v42 = vmul.f32 %v1664_v40, %v1664_v40 }
 0x78b   : > { %v1666_v43 = vsel %vm239_vm0, %v1665_v42, 0.0  ;;  %v3589_v42 = vld [vmem:[%s4804_s1 + $0x98] sm:$0xff] }
 0x78c   : > { %1667 = vadd.xlane.f32.xlu1 %v1666_v43  ;;  %v3596_v43 = vld [vmem:[%s4804_s1 + $0xd0] sm:$0xff] }
 0x78d   : > { %v4043_v45 = vpack.c.bf16 %v3597_v0, %v3596_v43 }
 0x819   : > { %v1668_v59 = vpop.xlane.xlu1 %1667 }
 0x81a   : > { %v1669_v60 = vmul.f32 0.03125, %v1668_v59 }
 0x81c   : > { %v1670_v61 = vadd.f32 1e-06, %v1669_v60  ;;  %v3592_v60 = vld [vmem:[%s4804_s1 + $0xb0] sm:$0xff] }
 0x81e   : > { %4123 = vrsqrt.f32 %v1670_v61  ;;  %v3593_v61 = vld [vmem:[%s4804_s1 + $0xb8] sm:$0xff] }
 0x828   : > { %v4124_v2 = vpop.eup %4123 }
 0x829   : > { %v1672_v3 = vmul.f32 %v4124_v2, %v1664_v40  ;;  %v3588_v40 = vld [vmem:[%s4804_s1 + $0x90] sm:$0xff]  ;;  %v1898_v2 = vrot.slane %v4574_v50, %v266_v41 }
 0x82a   : > { %v4031_v44 = vpack.c.bf16 %v3589_v42, %v3588_v40 }
 0x82b   : > { %v1677_v5 = vmul.f32 %v1676_v1, %v1672_v3  ;;  %v4037_v1 = vpack.c.bf16 %v3593_v61, %v3592_v60 }
 0x82d   : > { %v1682_v6 = vadd.f32 %v1681_v4, %v1677_v5 }
 0x82f   : > { %3847 = vmatmul.mubr.msk.f32.vlgmr.msra.gmra.mrb[16].mxu0 %vm239_vm0, %v1682_v6 }
 0x830   : > { %3876 = vmatprep.mubr.msk.f32.mxu0 %vm4210_vm1, %v4211_v18 }
 0x902   : > { %v1760_v12 = vpop.f32.mrb[16].mxu0 }
 0x903   : > { %v1761_v13 = vadd.f32 %v1760_v12, %v1690_v11  ;;  %v3848_v14 = vpop.f32.mrb[17].mxu0 }
 0x905   : > { %v1764_v15 = vmax.f32 %v1761_v13, 0.0 }
 0x907   : > { %3866 = vmatmul.mubr.msk.f32.vlgmr.msra.gmra.mrb[14].mxu1 %vm1777_vm3, %v1764_v15 }
 0x908   : > { %3898 = vmatprep.mubr.msk.f32.mxu1 %vm4210_vm1, %v4211_v18  ;;  %4041 = vmatpush3.bf16.msra.mxu1 %v4040_v39 }
 0x909   : > { %4042 = vmatprep.subr.bf16.mxu1 %v4209_v10 }
 0x90c   : > { %4044 = vmatpush3.bf16.msra.mxu1 %v4043_v45 }
 0x90d   : > { %3906 = vmatprep.subr.mxu1 %v4211_v18 }
 0x9da   : > { %v1847_v19 = vpop.f32.mrb[14].mxu1 }
 0x9db   : > { %v1848_v20 = vadd.f32 %v1847_v19, %v1776_v17  ;;  %v3867_v21 = vpop.f32.mrb[15].mxu1 }
 0x9dd   : > { %v4537_v22 = vadd.f32 %v1848_v20, %v4469_v36  ;;  %v4028_v36 = vpack.c.bf16 %v3587_v35, %v3586_v34 }
 0x9df   : > { %v1872_v23 = vsel %vm239_vm0, %v4537_v22, 0.0  ;;  %4029 = vmatpush3.bf16.msra.mxu0 %v4028_v36 }
 0x9e0   : > { %1873 = vadd.xlane.f32.xlu1 %v1872_v23  ;;  %4030 = vmatprep.subr.bf16.mxu0 %v4209_v10 }
 0x9e3   : > { %4032 = vmatpush3.bf16.msra.mxu0 %v4031_v44 }
 0x9e4   : > { %4033 = vmatprep.subr.bf16.mxu0 %v4209_v10 }
 0xa6d   : > { %v1874_v24 = vpop.xlane.xlu1 %1873 }
 0xa6e   : > { %v1875_v30 = vmul.f32 0.03125, %v1874_v24 }
 0xa70   : > { %v1876_v31 = vsub.f32 %v4537_v22, %v1875_v30 }
 0xa72   : > { %v1877_v32 = vmul.f32 %v1876_v31, %v1876_v31 }
 0xa74   : > { %v1878_v33 = vsel %vm239_vm0, %v1877_v32, 0.0 }
 0xa75   : > { %1879 = vadd.xlane.f32.xlu1 %v1878_v33 }
 0xb02   : > { %v1880_v46 = vpop.xlane.xlu1 %1879 }
 0xb03   : > { %v1881_v47 = vmul.f32 0.03125, %v1880_v46 }
 0xb05   : > { %v1882_v48 = vadd.f32 1e-06, %v1881_v47 }
 0xb07   : > { %4125 = vrsqrt.f32 %v1882_v48 }
 0xb11   : > { %v4126_v52 = vpop.eup %4125 }
 0xb12   : > { %v1884_v53 = vmul.f32 %v4126_v52, %v1876_v31 }
 0xb14   : > { %v1889_v57 = vmul.f32 %v1888_v51, %v1884_v53 }
 0xb16   : > { %v1894_v59 = vadd.f32 %v1893_v54, %v1889_v57 }
 0xb18   : > { %3877 = vmatmul.mubr.msk.f32.vlgmr.msra.gmra.mrb[18].mxu0 %vm239_vm0, %v1894_v59  ;;  %3899 = vmatmul.mubr.msk.f32.vlgmr.msra.gmra.mrb[16].mxu1 %vm239_vm0, %v1894_v59 }
 0xb19   : > { %4035 = vmatpush3.bf16.msra.mxu0 %v4034_v58  ;;  %3887 = vmatprep.mubr.msk.f32.mxu0 %vm4210_vm1, %v4211_v18 }
 0xb1a   : > { %4036 = vmatprep.subr.bf16.mxu0 %v4209_v10  ;;  %3908 = vmatprep.mubr.msk.f32.mxu1 %vm4210_vm1, %v4211_v18 }
 0xb1d   : > { %4038 = vmatpush3.bf16.msra.mxu0 %v4037_v1 }
 0xb1e   : > { %3901 = vmatprep.subr.mxu0 %v4211_v18 }
 0xb20   : > { %3888 = vmatmul.mubr.msk.f32.vlgmr.msra.gmra.mrb[20].mxu0 %vm239_vm0, %v1894_v59 }
 0xb21   : > { %3903 = vmatprep.mubr.msk.f32.mxu0 %vm4210_vm1, %v4211_v18 }
 0xbeb   : > { %v1968_v3 = vpop.f32.mrb[18].mxu0  ;;  %v4606_v4 = vpop.f32.mrb[16].mxu1 }
 0xbec   : > { %v1969_v5 = vadd.f32 %v1968_v3, %v1898_v2  ;;  %v3878_v6 = vpop.f32.mrb[19].mxu0  ;;  %v3900_v7 = vpop.f32.mrb[17].mxu1 }
 0xbee   : > { %v1972_v8 = vmul.f32 0.17677669, %v1969_v5  ;;  %v2050_v5 = vrot.slane %v4574_v50, %v418_v16 }
 0xbf0   : > { %2121 = vxpose.xlu1.b32.start.end [1/1] (short) (narrow) %v1972_v8, 32  ;;  %v2118_v6 = vadd.f32 %v4606_v4, %v2050_v5  ;;  %v3623_v5 = vld [vmem:[%s4805_s2 + $0x30] sm:$0xff] }
 0xbf3   : > { %v2043_v27 = vpop.f32.mrb[20].mxu0 }
 0xbf4   : > { %v2044_v11 = vadd.f32 %v2043_v27, %v1976_v9  ;;  %v3889_v12 = vpop.f32.mrb[21].mxu0 }
 0xbf6   : > { %2153 = vxpose.xlu0.b32.start.end [1/1] (short) (narrow) %v2044_v11, 32 }
 0xc70   : > { %v2137_v13 = vpop.trf.xlu1 }
 0xc71   : > { %2217 = vxpose.xlu0.b32.start.end [1/1] (short) (narrow) %v2137_v13, 8 }
 0xc74   : > { %v2138_v14 = vpop.trf.xlu1 }
 0xc75   : > { %2322 = vxpose.xlu1.b32.start.end [1/1] (short) (narrow) %v2138_v14, 8 }
 0xc76   : > { %v2169_v41 = vpop.trf.xlu0 }
 0xc77   : > { %3902 = vmatpush3.msra.mxu0 %v2169_v41 }
 0xc78   : > { %v2139_v15 = vpop.trf.xlu1  ;;  %3911 = vmatprep.subr.mxu0 %v4211_v18 }
 0xc79   : > { %2427 = vxpose.xlu0.b32.start.end [1/1] (short) (narrow) %v2139_v15, 8 }
 0xc7a   : > { %v2170_v17 = vpop.trf.xlu0 }
 0xc7b   : > { %3907 = vmatpush3.msra.mxu1 %v2170_v17 }
 0xc7c   : > { %v2140_v19 = vpop.trf.xlu1  ;;  %3916 = vmatprep.subr.mxu1 %v4211_v18 }
 0xc7d   : > { %2532 = vxpose.xlu0.b32.start.end [1/1] (short) (narrow) %v2140_v19, 8 }
 0xc7e   : > { %v2171_v49 = vpop.trf.xlu0 }
 0xc82   : > { %v2172_v20 = vpop.trf.xlu0 }
 0xcf1   : > { %v2233_v21 = vpop.trf.xlu0 }
 0xcf2   : > { %3904 = vmatmul.mubr.msk.f32.vlgmr.msra.gmra.mrb[22].mxu0 %vm618_vm2, %v2233_v21  ;;  %v3598_v21 = vld [vmem:[%s4804_s1 + $0xe0] sm:$0xff] }
 0xcf3   : > { %3912 = vmatpush3.msra.mxu0 %v2171_v49  ;;  %3913 = vmatprep.mubr.msk.f32.mxu0 %vm4210_vm1, %v4211_v18 }
 0xcf4   : > { %3921 = vmatprep.subr.mxu0 %v4211_v18 }
 0xcf5   : > { %v2338_v23 = vpop.trf.xlu1 }
 0xcf6   : > { %3909 = vmatmul.mubr.msk.f32.vlgmr.msra.gmra.mrb[18].mxu1 %vm618_vm2, %v2338_v23  ;;  %v3599_v23 = vld [vmem:[%s4804_s1 + $0xe8] sm:$0xff] }
 0xcf7   : > { %3917 = vmatpush3.msra.mxu1 %v2172_v20  ;;  %3918 = vmatprep.mubr.msk.f32.mxu1 %vm4210_vm1, %v4211_v18 }
 0xcf8   : > { %3926 = vmatprep.subr.mxu1 %v4211_v18 }
 0xcf9   : > { %v2443_v24 = vpop.trf.xlu0 }
 0xcfa   : > { %3914 = vmatmul.mubr.msk.f32.vlgmr.msra.gmra.mrb[24].mxu0 %vm618_vm2, %v2443_v24  ;;  %v3600_v24 = vld [vmem:[%s4804_s1 + $0xf0] sm:$0xff] }
 0xcfb   : > { %3923 = vmatprep.mubr.msk.f32.mxu0 %vm4210_vm1, %v4211_v18 }
 0xcfd   : > { %v2548_v30 = vpop.trf.xlu0 }
 0xcfe   : > { %3919 = vmatmul.mubr.msk.f32.vlgmr.msra.gmra.mrb[20].mxu1 %vm618_vm2, %v2548_v30 }
 0xcff   : > { %3928 = vmatprep.mubr.msk.f32.mxu1 %vm4210_vm1, %v4211_v18 }
 0xdc5   : > { %v2318_v31 = vpop.f32.mrb[22].mxu0 }
 0xdc6   : > { %v2637_v32 = vsel %vm618_vm2, %v2318_v31, -inf  ;;  %v3905_v33 = vpop.f32.mrb[23].mxu0 }
 0xdc7   : > { %2638 = vmax.xlane.f32.xlu0 %v2637_v32  ;;  %v3601_v32 = vld [vmem:[%s4804_s1 + $0xf8] sm:$0xff] }
 0xdc9   : > { %v2423_v34 = vpop.f32.mrb[18].mxu1 }
 0xdca   : > { %v3910_v35 = vpop.f32.mrb[19].mxu1  ;;  %v2640_v36 = vsel %vm618_vm2, %v2423_v34, -inf }
 0xdcb   : > { %2641 = vmax.xlane.f32.xlu1 %v2640_v36 }
 0xdcd   : > { %v2528_v37 = vpop.f32.mrb[24].mxu0 }
 0xdce   : > { %v3915_v38 = vpop.f32.mrb[25].mxu0  ;;  %v2643_v39 = vsel %vm618_vm2, %v2528_v37, -inf }
 0xdcf   : > { %2644 = vmax.xlane.f32.xlu1 %v2643_v39 }
 0xdd1   : > { %v2633_v40 = vpop.f32.mrb[20].mxu1 }
 0xdd2   : > { %v2646_v42 = vsel %vm618_vm2, %v2633_v40, -inf  ;;  %v3920_v43 = vpop.f32.mrb[21].mxu1 }
 0xdd3   : > { %2647 = vmax.xlane.f32.xlu0 %v2646_v42 }
 0xe54   : > { %v2639_v44 = vpop.xlane.xlu0 %2638 }
 0xe55   : > { %v2649_v0 = vsub.f32 %v2318_v31, %v2639_v44 }
 0xe57   : > { %v2653_v45 = vmul.f32 1.442695, %v2649_v0 }
 0xe58   : > { %v2642_v46 = vpop.xlane.xlu1 %2641 }
 0xe59   : > { %4127 = vpow2.f32 %v2653_v45  ;;  %v2650_v47 = vsub.f32 %v2423_v34, %v2642_v46 }
 0xe5b   : > { %v2655_v48 = vmul.f32 1.442695, %v2650_v47 }
 0xe5c   : > { %v2645_v51 = vpop.xlane.xlu1 %2644 }
 0xe5d   : > { %4129 = vpow2.f32 %v2655_v48  ;;  %v2651_v52 = vsub.f32 %v2528_v37, %v2645_v51 }
 0xe5f   : > { %v2657_v53 = vmul.f32 1.442695, %v2651_v52 }
 0xe60   : > { %v2648_v54 = vpop.xlane.xlu0 %2647 }
 0xe61   : > { %4131 = vpow2.f32 %v2657_v53  ;;  %v2652_v55 = vsub.f32 %v2633_v40, %v2648_v54 }
 0xe63   : > { %v4128_v56 = vpop.eup %4127  ;;  %v2659_v57 = vmul.f32 1.442695, %v2652_v55 }
 0xe64   : > { %v2661_v58 = vsel %vm618_vm2, %v4128_v56, 0.0 }
 0xe65   : > { %4133 = vpow2.f32 %v2659_v57  ;;  %2662 = vadd.xlane.f32.xlu1 %v2661_v58 }
 0xe67   : > { %v4130_v59 = vpop.eup %4129 }
 0xe68   : > { %v2664_v60 = vsel %vm618_vm2, %v4130_v59, 0.0 }
 0xe69   : > { %2665 = vadd.xlane.f32.xlu0 %v2664_v60 }
 0xe6b   : > { %v4132_v61 = vpop.eup %4131 }
 0xe6c   : > { %v2667_v1 = vsel %vm618_vm2, %v4132_v61, 0.0 }
 0xe6d   : > { %2668 = vadd.xlane.f32.xlu1 %v2667_v1 }
 0xe6f   : > { %v4134_v2 = vpop.eup %4133 }
 0xe70   : > { %v2670_v3 = vsel %vm618_vm2, %v4134_v2, 0.0 }
 0xe71   : > { %2671 = vadd.xlane.f32.xlu0 %v2670_v3 }
 0xea0   : > { %2185 = vxpose.xlu1.b32.start.end [1/1] (short) (narrow) %v2118_v6, 32  ;;  %v3624_v6 = vld [vmem:[%s4805_s2 + $0x38] sm:$0xff] }
 0xef2   : > { %v2663_v7 = vpop.xlane.xlu1 %2662 }
 0xef3   : > { %4135 = vrcp.f32 %v2663_v7  ;;  %v4049_v7 = vpack.c.bf16 %v3624_v6, %v3623_v5 }
 0xef6   : > { %v2666_v8 = vpop.xlane.xlu0 %2665 }
 0xef7   : > { %4137 = vrcp.f32 %v2666_v8  ;;  %v3626_v8 = vld [vmem:[%s4806_s3 + $0x40] sm:$0xff] }
 0xefa   : > { %v2669_v9 = vpop.xlane.xlu1 %2668 }
 0xefb   : > { %4139 = vrcp.f32 %v2669_v9  ;;  %v3627_v9 = vld [vmem:[%s4806_s3 + $0x48] sm:$0xff] }
 0xefd   : > { %v4136_v11 = vpop.eup %4135 }
 0xefe   : > { %v2672_v27 = vpop.xlane.xlu0 %2671  ;;  %v2674_v13 = vmul.f32 %v4136_v11, %v4128_v56  ;;  %v4052_v11 = vpack.c.bf16 %v3627_v9, %v3626_v8 }
 0xeff   : > { %4141 = vrcp.f32 %v2672_v27  ;;  %v3628_v27 = vld [vmem:[%s4806_s3 + $0x50] sm:$0xff] }
 0xf01   : > { %v4138_v14 = vpop.eup %4137 }
 0xf02   : > { %v2676_v4 = vmul.f32 %v4138_v14, %v4130_v59  ;;  %v3630_v14 = vld [vmem:[%s4806_s3 + $0x60] sm:$0xff] }
 0xf05   : > { %v4140_v41 = vpop.eup %4139 }
 0xf06   : > { %v2678_v17 = vmul.f32 %v4140_v41, %v4132_v61 }
 0xf09   : > { %v4142_v19 = vpop.eup %4141 }
 0xf0a   : > { %v2680_v20 = vmul.f32 %v4142_v19, %v4134_v2  ;;  %v3306_v19 = vrot.slane %v4574_v50, %v1675_v62  ;;  %v3633_v62 = vld [vmem:[%s4806_s3 + $0x78] sm:$0xff] }
 0xf20   : > { %v2201_v12 = vpop.trf.xlu1 }
 0xf21   : > { %3922 = vmatpush3.xpose.msk.msra.mxu0 %vm618_vm2, %v2201_v12  ;;  %v3629_v12 = vld [vmem:[%s4806_s3 + $0x58] sm:$0xff] }
 0xf22   : > { %3931 = vmatprep.subr.mxu0 %v4211_v18 }
 0xf24   : > { %3924 = vmatmul.mubr.msk.f32.vlgmr.msra.gmra.mrb[26].mxu0 %vm618_vm2, %v2674_v13  ;;  %v2202_v16 = vpop.trf.xlu1  ;;  %v4055_v13 = vpack.c.bf16 %v3629_v12, %v3628_v27 }
 0xf25   : > { %3927 = vmatpush3.xpose.msk.msra.mxu1 %vm618_vm2, %v2202_v16  ;;  %3933 = vmatprep.mubr.msk.f32.mxu0 %vm4210_vm1, %v4211_v18  ;;  %v3631_v16 = vld [vmem:[%s4806_s3 + $0x68] sm:$0xff] }
 0xf26   : > { %3936 = vmatprep.subr.mxu1 %v4211_v18 }
 0xf28   : > { %3929 = vmatmul.mubr.msk.f32.vlgmr.msra.gmra.mrb[22].mxu1 %vm618_vm2, %v2676_v4  ;;  %v2203_v15 = vpop.trf.xlu1  ;;  %v4058_v4 = vpack.c.bf16 %v3631_v16, %v3630_v14 }
 0xf29   : > { %3932 = vmatpush3.xpose.msk.msra.mxu0 %vm618_vm2, %v2203_v15  ;;  %3938 = vmatprep.mubr.msk.f32.mxu1 %vm4210_vm1, %v4211_v18 }
 0xf2a   : > { %3941 = vmatprep.subr.mxu0 %v4211_v18 }
 0xf2c   : > { %3934 = vmatmul.mubr.msk.f32.vlgmr.msra.gmra.mrb[28].mxu0 %vm618_vm2, %v2678_v17  ;;  %v2204_v49 = vpop.trf.xlu1 }
 0xf2d   : > { %3937 = vmatpush3.xpose.msk.msra.mxu1 %vm618_vm2, %v2204_v49  ;;  %3943 = vmatprep.mubr.msk.f32.mxu0 %vm4210_vm1, %v4211_v18 }
 0xf2e   : > { %3946 = vmatprep.subr.mxu1 %v4211_v18  ;;  %3942 = vmatpush3.msra.mxu0 %v3598_v21  ;;  %v3311_v21 = vrot.slane %v4574_v50, %v1680_v63  ;;  %v3321_v63 = vrot.slane %v3585_v25, %v4347_v28 }
 0xf2f   : > { %3951 = vmatprep.subr.mxu0 %v4211_v18 }
 0xf30   : > { %3939 = vmatmul.mubr.msk.f32.vlgmr.msra.gmra.mrb[24].mxu1 %vm618_vm2, %v2680_v20 }
 0xf31   : > { %3948 = vmatprep.mubr.msk.f32.mxu1 %vm4210_vm1, %v4211_v18  ;;  %3947 = vmatpush3.msra.mxu1 %v3599_v23 }
 0xf32   : > { %3956 = vmatprep.subr.mxu1 %v4211_v18 }
 0xff7   : > { %v2753_v30 = vpop.f32.mrb[26].mxu0 }
 0xff8   : > { %v3925_v31 = vpop.f32.mrb[27].mxu0  ;;  %3944 = vmatmul.mubr.msk.f32.vlgmr.msra.gmra.mrb[30].mxu0 %vm618_vm2, %v2753_v30 }
 0xff9   : > { %3952 = vmatpush3.msra.mxu0 %v3600_v24  ;;  %3953 = vmatprep.mubr.msk.f32.mxu0 %vm4210_vm1, %v4211_v18 }
 0xffa   : > { %4045 = vmatprep.subr.bf16.mxu0 %v4209_v10 }
 0xffb   : > { %v2829_v33 = vpop.f32.mrb[22].mxu1 }
 0xffc   : > { %v3930_v34 = vpop.f32.mrb[23].mxu1  ;;  %3949 = vmatmul.mubr.msk.f32.vlgmr.msra.gmra.mrb[26].mxu1 %vm618_vm2, %v2829_v33 }
 0xffd   : > { %3957 = vmatpush3.msra.mxu1 %v3601_v32  ;;  %3958 = vmatprep.mubr.msk.f32.mxu1 %vm4210_vm1, %v4211_v18  ;;  %v3408_v34 = vrot.slane %v3585_v25, %v4339_v26 }
 0xffe   : > { %4051 = vmatprep.subr.bf16.mxu1 %v4209_v10 }
 0xfff   : > { %v2905_v35 = vpop.f32.mrb[28].mxu0 }
0x1000   : > { %v3935_v36 = vpop.f32.mrb[29].mxu0  ;;  %3954 = vmatmul.mubr.msk.f32.vlgmr.msra.gmra.mrb[32].mxu0 %vm618_vm2, %v2905_v35 }
0x1001   : > { %3969 = vmatprep.mubr.msk.f32.mxu0 %vm4210_vm1, %v4211_v18 }
0x1003   : > { %v2981_v37 = vpop.f32.mrb[24].mxu1 }
0x1004   : > { %v3940_v38 = vpop.f32.mrb[25].mxu1  ;;  %3959 = vmatmul.mubr.msk.f32.vlgmr.msra.gmra.mrb[28].mxu1 %vm618_vm2, %v2981_v37 }
0x1005   : > { %3988 = vmatprep.mubr.msk.f32.mxu1 %vm4210_vm1, %v4211_v18  ;;  %v3288_v18 = vrot.slane %v4574_v50, %v1657_v29  ;;  %v3621_v29 = vld [vmem:[%s4805_s2 + $0x20] sm:$0xff]  ;;  %4053 = vmatpush3.bf16.msra.mxu1 %v4052_v11 }
0x1006   : > { %4054 = vmatprep.subr.bf16.mxu1 %v4209_v10 }
0x1009   : > { %4056 = vmatpush3.bf16.msra.mxu1 %v4055_v13 }
0x100a   : > { %4057 = vmatprep.subr.bf16.mxu1 %v4209_v10 }
0x100d   : > { %4059 = vmatpush3.bf16.msra.mxu1 %v4058_v4 }
0x100e   : > { %4060 = vmatprep.subr.bf16.mxu1 %v4209_v10 }
0x10cb   : > { %v3054_v39 = vpop.f32.mrb[30].mxu0 }
0x10cc   : > { %v3945_v40 = vpop.f32.mrb[31].mxu0  ;;  %v3277_v43 = vsel %vm239_vm0, %v3054_v39, 0.0 }
0x10cf   : > { %v3127_v42 = vpop.f32.mrb[26].mxu1 }
0x10d0   : > { %v3278_v44 = vsel %vm239_vm0, %v3127_v42, 0.0  ;;  %v3950_v0 = vpop.f32.mrb[27].mxu1 }
0x10d1   : > { %v3279_v45 = vadd.f32 %v3278_v44, %v3277_v43 }
0x10d3   : > { %v3200_v46 = vpop.f32.mrb[32].mxu0 }
0x10d4   : > { %v3280_v47 = vsel %vm239_vm0, %v3200_v46, 0.0  ;;  %v3955_v48 = vpop.f32.mrb[33].mxu0 }
0x10d5   : > { %v3281_v51 = vadd.f32 %v3280_v47, %v3279_v45 }
0x10d7   : > { %v3273_v52 = vpop.f32.mrb[28].mxu1 }
0x10d8   : > { %v3282_v53 = vsel %vm239_vm0, %v3273_v52, 0.0  ;;  %v3960_v54 = vpop.f32.mrb[29].mxu1 }
0x10d9   : > { %v3283_v55 = vadd.f32 %v3282_v53, %v3281_v51 }
0x10db   : > { %v3284_v56 = vadd.f32 %v3283_v55, %v4537_v22  ;;  %v3622_v22 = vld [vmem:[%s4805_s2 + $0x28] sm:$0xff] }
0x10dc   : > { %v4046_v3 = vpack.c.bf16 %v3622_v22, %v3621_v29 }
0x10dd   : > { %v4695_v57 = vadd.f32 %v3288_v18, %v3284_v56 }
0x10de   : > { %4047 = vmatpush3.bf16.msra.mxu0 %v4046_v3 }
0x10df   : > { %v3290_v58 = vsel %vm239_vm0, %v4695_v57, 0.0  ;;  %4048 = vmatprep.subr.bf16.mxu0 %v4209_v10  ;;  %v3632_v10 = vld [vmem:[%s4806_s3 + $0x70] sm:$0xff] }
0x10e0   : > { %3291 = vadd.xlane.f32.xlu0 %v3290_v58  ;;  %v4061_v30 = vpack.c.bf16 %v3633_v62, %v3632_v10 }
0x10e2   : > { %4050 = vmatpush3.bf16.msra.mxu0 %v4049_v7  ;;  %4062 = vmatpush3.bf16.msra.mxu1 %v4061_v30 }
0x116d   : > { %v3292_v59 = vpop.xlane.xlu0 %3291 }
0x116e   : > { %v3293_v60 = vmul.f32 0.03125, %v3292_v59 }
0x1170   : > { %v3294_v61 = vsub.f32 %v4695_v57, %v3293_v60 }
0x1172   : > { %v3295_v1 = vmul.f32 %v3294_v61, %v3294_v61 }
0x1174   : > { %v3296_v2 = vsel %vm239_vm0, %v3295_v1, 0.0 }
0x1175   : > { %3297 = vadd.xlane.f32.xlu0 %v3296_v2 }
0x1202   : > { %v3298_v41 = vpop.xlane.xlu0 %3297 }
0x1203   : > { %v3299_v15 = vmul.f32 0.03125, %v3298_v41 }
0x1205   : > { %v3300_v17 = vadd.f32 1e-06, %v3299_v15 }
0x1207   : > { %4143 = vrsqrt.f32 %v3300_v17 }
0x1211   : > { %v4144_v49 = vpop.eup %4143 }
0x1212   : > { %v3302_v20 = vmul.f32 %v4144_v49, %v3294_v61 }
0x1214   : > { %v3307_v23 = vmul.f32 %v3306_v19, %v3302_v20 }
0x1216   : > { %v3312_v24 = vadd.f32 %v3311_v21, %v3307_v23 }
0x1218   : > { %3970 = vmatmul.mubr.msk.f32.vlgmr.msra.gmra.mrb[34].mxu0 %vm239_vm0, %v3312_v24 }
0x12eb   : > { %v3391_v50 = vpop.f32.mrb[34].mxu0 }
0x12ec   : > { %v3392_v31 = vadd.f32 %v3391_v50, %v3321_v63  ;;  %v3971_v32 = vpop.f32.mrb[35].mxu0 }
0x12ee   : > { %v3395_v33 = vmax.f32 %v3392_v31, 0.0 }
0x12f0   : > { %3989 = vmatmul.mubr.msk.f32.vlgmr.msra.gmra.mrb[30].mxu1 %vm1777_vm3, %v3395_v33 }
0x13c3   : > { %v3478_v35 = vpop.f32.mrb[30].mxu1 }
0x13c4   : > { %v3479_v36 = vadd.f32 %v3478_v35, %v3408_v34  ;;  %v3990_v37 = vpop.f32.mrb[31].mxu1 }
0x13c6   : > { %v3482_v38 = vadd.f32 %v3479_v36, %v4695_v57 }
0x13c8   : > { %3483 = vst.msk [vmem:[%s215_s30] sm:$0xff] %vm239_vm0, %v3482_v38 }
0x13c9   : > { %4158 = shalt.err (!%p4155_p3)
}
0x13ca   : > { %s4159_s14 = scalar_lea.hbm %s4760_s9, 128  ;;  %s4163_s17 = scalar_lea.hbm %s4808_s5, 256 }
0x13cb   : > { %p4160_p4 = scmp.ne.s32.totalorder %s4760_s9, %s4159_s14  ;;  %p4164_p9 = scmp.lt.u32.totalorder %s4760_s9, %s4808_s5 }
0x13cc   : > { %p4165_p10 = scmp.lt.u32.totalorder %s4163_s17, %s4159_s14  ;;  %p4167_p12 = scmp.lt.u32.totalorder %s4159_s14, %s4760_s9 }
0x13cd   : > { %p4161_p7 = pnand %p4160_p4, %p4281_p5 }
0x13ce   : > { %p4166_p11 = por %p4165_p10, %p4164_p9 }
0x13cf   : > { %p4162_p8 = pneg %p4161_p7 }
0x13d0   : > { %p4168_p13 = por %p4167_p12, %p4166_p11 }
0x13d2   : > { %p4169_p0 = pnand %p4168_p13, %p4162_p8 }
0x13d4   : > { %4172 = shalt.err (!%p4169_p0)
}
0x13d5   : > { %4063 = dma.vmem_to_hbm [thread:$0]  (%p4281_p5), %s4762_s6, 128, %s4760_s9, %s3485_s10  }
0x13d6 PF: > { %p4069_p1 = scmp.ge.s32.totalorder %s4207_s21, 2  ;;  %s3510_s26 = sand.u32 1, %s4195_s18  }
0x13d7   : > { %s3511_s30 = scalar_lea.sflag [#allocation3], %s3510_s26 }
0x13d8   : > { %p4066_p2 = pnand %p4069_p1, %p4285_p6 }
0x13da   : > { %4190 = dma.done.wait (!%p4066_p2), %s3511_s30, 128  }
0x13db   : > { %4192 = vsyncadd (!%p4066_p2), %s3511_s30, 4294967168  ;;  %p15_p3 = scmp.ge.s32.totalorder %s4268_s24, 4   ;;  %s4811_s18 = smov %s4199_s19 }
0x13dc   : > { %s4812_s19 = smov %s4203_s20  ;;  %s4813_s20 = smov %s4279_s27 }
0x13dd   : > { %s4814_s21 = smov %s4268_s24  ;;  %17 = sbr.rel (!%p15_p3) target bundleno = 3 (0x3), region = 79 }
0x13e4   :  { %3516 = vsyncpa [#allocation3], 1 }
0x13e5   :  { %3518 = vsyncpa [#allocation3 + $0x1], 1 }

</bundles_post_ra>
